<compile_context>
chip_gen: v5e
topology: v5e:2x2
jax: 0.10.0
libtpu: 0.0.40
codegen_flags: <defaults>
</compile_context>

<pallas_src>
import functools

import jax
import jax.numpy as jnp
import numpy as np
from jax.experimental import pallas as pl
from jax.experimental.pallas import tpu as pltpu

# ----------------------------- small config ---------------------------------
B = 2             # batch
T = 24            # sequence length
CX = 6            # dynamic input channels fed as `x` (B, CX, T)
CXP = ((CX + 7) // 8) * 8   # dynamic channels padded for alignment (=8)
NUM_STATIC = 8    # static feature dim `s` (B, NUM_STATIC)
CH = 16           # num_channels = [CH, CH, CH, CH]
SDIM = 16         # s_param hidden/out dims = [SDIM, SDIM, SDIM, dropout]
CDIM = 16         # c_param = [CDIM, CDIM, dropout]
SCDIM = 16        # sc_param = [SCDIM, SCDIM, SCDIM, dropout]
KSIZE = 3         # kernel_size
DILATIONS = (1, 2, 4, 8)

SLAB_W = 128      # parameter-slab lane width (one full lane group)


# --------------------------- host-side packing -------------------------------
def pack_params(params, *, bsz=B, t_len=T, cx=CX):
    """Pack every weight/bias (plus the causal time-index rows) into ONE f32 slab.

    Returns (slab, layout); layout maps name -> (row_start, rows, cols) with every
    row_start 8-aligned so in-kernel static slices are clean sub-tile reads.
    """
    npf = lambda a: np.asarray(a, np.float32)
    sections = []

    # per-row time index within each batch block (drives the causal masks)
    tvals = (np.arange(bsz * t_len) % t_len).astype(np.float32)
    sections.append(("tidx", np.repeat(tvals[:, None], CH, axis=1)))

    # --- five static MLPs stacked block-diagonally: [s1|s2|s3|static|s_comp] ---
    heads = [params[k] for k in ("static1", "static2", "static3", "static",
                                 "s_composite")]
    nh = len(heads)
    sw0 = np.zeros((NUM_STATIC, nh * SDIM), np.float32)
    sb0 = np.zeros((1, nh * SDIM), np.float32)
    sw1 = np.zeros((nh * SDIM, nh * SDIM), np.float32)
    sb1 = np.zeros((1, nh * SDIM), np.float32)
    sw2 = np.zeros((nh * SDIM, nh * SDIM), np.float32)
    sb2 = np.zeros((1, nh * SDIM), np.float32)
    for i, hp in enumerate(heads):
        c0 = SDIM * i
        sw0[:, c0:c0 + SDIM] = npf(hp["w0"])
        sb0[:, c0:c0 + SDIM] = npf(hp["b0"])
        sw1[c0:c0 + SDIM, c0:c0 + SDIM] = npf(hp["w1"])
        sb1[:, c0:c0 + SDIM] = npf(hp["b1"])
        w2, b2 = npf(hp["w2"]), npf(hp["b2"])
        sw2[c0:c0 + SDIM, c0:c0 + w2.shape[1]] = w2
        sb2[:, c0:c0 + b2.shape[1]] = b2
    sections += [("sw0", sw0), ("sb0", sb0), ("sw1", sw1), ("sb1", sb1),
                 ("sw2", sw2), ("sb2", sb2)]

    # --- temporal blocks: fuse the K taps (+ 1x1 residual) along N ---
    def pad_tb1_rows(w):      # (cx + NUM_STATIC, n) -> (CXP + NUM_STATIC, n)
        out = np.zeros((CXP + NUM_STATIC, w.shape[1]), np.float32)
        out[:cx] = w[:cx]
        out[CXP:] = w[cx:]
        return out

    def tap_cat(w_kio):       # (K, Cin, CH) -> (Cin, K*CH)
        return np.concatenate([npf(w_kio[k]) for k in range(KSIZE)], axis=1)

    # TB1: the host input already carries [x | s], so dyn+static is one matrix.
    p = params["tb1"]
    w1full = np.concatenate([pad_tb1_rows(tap_cat(npf(p["w1"]))),
                             pad_tb1_rows(npf(p["wd"]))], axis=1)     # (16, 64)
    bb = np.concatenate([npf(p["b1"]), npf(p["bd"])], axis=1)         # (1, 32)
    sections += [("tb1_w1", w1full), ("tb1_b", bb),
                 ("tb1_w2", tap_cat(npf(p["w2"]))), ("tb1_b2", npf(p["b2"]))]

    for key in ("tb2", "tb3", "tb4"):
        p = params[key]
        w1, wd = npf(p["w1"]), npf(p["wd"])
        wdyn = np.concatenate([tap_cat(w1[:, :CH, :]), wd[:CH, :]], axis=1)
        wstat = np.concatenate([tap_cat(w1[:, CH:, :]), wd[CH:, :]], axis=1)
        bb = np.concatenate([npf(p["b1"]), npf(p["bd"])], axis=1)
        sections += [(f"{key}_wdyn", wdyn), (f"{key}_wstat", wstat),
                     (f"{key}_b", bb), (f"{key}_w2", tap_cat(npf(p["w2"]))),
                     (f"{key}_b2", npf(p["b2"]))]

    # --- composite head ---
    c = params["composite"]
    w0 = npf(c["w0"])
    sections += [("c_w0x", w0[:CH, :]), ("c_w0s", w0[CH:, :]),
                 ("c_b0", npf(c["b0"])), ("c_w1", npf(c["w1"])),
                 ("c_b1", npf(c["b1"])), ("c_w2r", npf(c["w2"]).T),
                 ("c_b2", npf(c["b2"]))]

    # --- assemble the slab (every section 8-row aligned) ---
    layout, row = {}, 0
    for name, arr in sections:
        assert arr.ndim == 2 and arr.shape[1] <= SLAB_W, (name, arr.shape)
        layout[name] = (row, arr.shape[0], arr.shape[1])
        row += ((arr.shape[0] + 7) // 8) * 8
    slab = np.zeros((row, SLAB_W), np.float32)
    for name, arr in sections:
        r, h, w = layout[name]
        slab[r:r + h, :w] = arr
    return jnp.asarray(slab), layout


# ------------------------------ fused kernel ---------------------------------
def fused_forward_kernel(xin_ref, slab_ref, o_ref, *, layout):
    relu = lambda v: jnp.maximum(v, 0.0)
    mm = lambda a, b: jnp.dot(a, b, preferred_element_type=jnp.float32)

    def W(name):                         # static slab carve -> VMEM load
        r, h, w = layout[name]
        return slab_ref[r:r + h, 0:w]

    xin = xin_ref[...]                              # (BT, CXP+NS): [x | s bcast]
    s_bt = xin[:, CXP:CXP + NUM_STATIC]             # (BT, NS) broadcast static feats
    tidx = W("tidx")                                # (BT, CH) time-within-block

    def shift_mask(v, sh):
        # Causal shift by `sh` steps within each length-T batch block: roll moves
        # row t-sh -> t, the mask kills the first `sh` rows of every batch block
        # (also exactly right for time-constant static channels, so the hoisted
        # static term shares this epilogue).
        if sh == 0:
            return v
        rolled = pltpu.roll(v, shift=sh, axis=0)    # sublane rotate (XLU slot)
        return jnp.where(tidx >= float(sh), rolled, 0.0)

    def conv_taps(y, dil, bias):
        # y: (BT, KSIZE*CH [+CH]) fused tap outputs; tap k shifted by (K-1-k)*dil.
        acc = None
        for k in range(KSIZE):
            tap = shift_mask(y[:, CH * k:CH * (k + 1)], (KSIZE - 1 - k) * dil)
            acc = tap if acc is None else acc + tap
        return acc + bias

    def temporal_block(y, w2, b1bd, b2, dil):
        # y: (BT, (KSIZE+1)*CH) = fused conv1 taps + fused 1x1 residual columns.
        h1 = relu(conv_taps(y, dil, b1bd[:, 0:CH]))
        res = y[:, KSIZE * CH:(KSIZE + 1) * CH] + b1bd[:, CH:2 * CH]
        h2 = relu(conv_taps(mm(h1, w2), dil, b2))
        return relu(h2 + res)

    # ---- five static MLPs, stacked block-diagonally (3 MXU pushes total) ----
    hs = relu(mm(s_bt, W("sw0")) + W("sb0"))
    hs = relu(mm(hs, W("sw1")) + W("sb1"))
    souts = mm(hs, W("sw2")) + W("sb2")             # (BT, 80): [s1|s2|s3|static|sc]

    # ---- TB1 (x and raw s already concatenated host-side -> a single push) ----
    x = temporal_block(mm(xin, W("tb1_w1")), W("tb1_w2"),
                       W("tb1_b"), W("tb1_b2"), DILATIONS[0])

    # ---- TB2..TB4 (dynamic push + hoisted static-channel push per block) ----
    for i, (key, dil) in enumerate(zip(("tb2", "tb3", "tb4"), DILATIONS[1:])):
        s_feat = souts[:, SDIM * i:SDIM * (i + 1)]
        y = mm(x, W(f"{key}_wdyn")) + mm(s_feat, W(f"{key}_wstat"))
        x = temporal_block(y, W(f"{key}_w2"), W(f"{key}_b"), W(f"{key}_b2"), dil)

    # ---- composite head + s_composite scalar add ----
    stat = souts[:, 3 * SDIM:4 * SDIM]
    hc = relu(mm(x, W("c_w0x")) + mm(stat, W("c_w0s")) + W("c_b0"))
    hc = relu(mm(hc, W("c_w1")) + W("c_b1"))
    # final (CDIM -> 1) layer as VPU multiply + lane reduction (no N=1 MXU matmul)
    y = jnp.sum(hc * W("c_w2r"), axis=-1, keepdims=True) + W("c_b2")    # (BT, 1)
    y = y + souts[:, 4 * SDIM:4 * SDIM + 1]                             # + s_comp
    o_ref[...] = y.astype(o_ref.dtype)


# ------------------------------- wrapper --------------------------------------
def forward(slab, x_bct, s, *, layout):
    """x_bct: PyTorch-style NCW input (B, CX, T); s: (B, NUM_STATIC) -> (B, T, 1)."""
    bsz, cx, t_len = x_bct.shape
    bt = bsz * t_len

    x2d = jnp.transpose(x_bct, (0, 2, 1)).reshape(bt, cx)   # channels-last, folded
    x2d = jnp.pad(x2d, ((0, 0), (0, CXP - cx)))
    s_bt = jnp.repeat(s, t_len, axis=0)                     # pre-broadcast over time
    xin = jnp.concatenate([x2d, s_bt], axis=1).astype(jnp.float32)   # (BT, 16)

    vmem = pl.BlockSpec(memory_space=pltpu.MemorySpace.VMEM)
    out = pl.pallas_call(
        functools.partial(fused_forward_kernel, layout=layout),
        out_shape=jax.ShapeDtypeStruct((bt, 1), jnp.float32),
        in_specs=[vmem, vmem],
        out_specs=vmem,
    )(xin, slab)
    return out.reshape(bsz, t_len, 1)


# --------------------------- pure-JAX reference ------------------------------
def _tb_ref(x, p, dilation):
    k = p["w1"].shape[0]
    pad = (k - 1) * dilation

    def conv(inp, w, b):
        out = jax.lax.conv_general_dilated(
            inp, w, window_strides=(1,), padding=[(pad, 0)],
            rhs_dilation=(dilation,), dimension_numbers=("NWC", "WIO", "NWC"))
        return out + b

    h1 = jax.nn.relu(conv(x, p["w1"], p["b1"]))
    h2 = jax.nn.relu(conv(h1, p["w2"], p["b2"]))
    res = jnp.einsum("btc,cd->btd", x, p["wd"]) + p["bd"]
    return jax.nn.relu(h2 + res)


def _mlp3_ref(s, p):
    h = jax.nn.relu(s @ p["w0"] + p["b0"])
    h = jax.nn.relu(h @ p["w1"] + p["b1"])
    return h @ p["w2"] + p["b2"]


def _composite_ref(xc, p, sc):
    h = jax.nn.relu(jnp.einsum("btc,cd->btd", xc, p["w0"]) + p["b0"])
    h = jax.nn.relu(jnp.einsum("btc,cd->btd", h, p["w1"]) + p["b1"])
    y = jnp.einsum("btc,cd->btd", h, p["w2"]) + p["b2"]
    return y + sc[:, None, :]


def forward_ref(params, x_bct, s):
    bsz, _, t = x_bct.shape
    x = jnp.transpose(x_bct, (0, 2, 1))                      # (B, T, CX)

    def cat_static(xx, feat):
        return jnp.concatenate(
            [xx, jnp.broadcast_to(feat[:, None, :], (bsz, t, feat.shape[-1]))],
            axis=-1)

    x = _tb_ref(cat_static(x, s), params["tb1"], 1)
    x = _tb_ref(cat_static(x, _mlp3_ref(s, params["static1"])), params["tb2"], 2)
    x = _tb_ref(cat_static(x, _mlp3_ref(s, params["static2"])), params["tb3"], 4)
    x = _tb_ref(cat_static(x, _mlp3_ref(s, params["static3"])), params["tb4"], 8)

    xc = cat_static(x, _mlp3_ref(s, params["static"]))
    sc = _mlp3_ref(s, params["s_composite"])
    return _composite_ref(xc, params["composite"], sc)       # (B, T, 1)


# ------------------------------- parameters ----------------------------------
def init_params(key):
    keys = iter(jax.random.split(key, 64))

    def nrm(shape, scale):
        return (scale * jax.random.normal(next(keys), shape)).astype(jnp.float32)

    def tb(cin, cout):
        # conv weights stored as (K, Cin, Cout); 0.01-scale normal like init_weights()
        return dict(
            w1=nrm((KSIZE, cin, cout), 0.01), b1=nrm((1, cout), 0.01),
            w2=nrm((KSIZE, cout, cout), 0.01), b2=nrm((1, cout), 0.01),
            wd=nrm((cin, cout), 0.01), bd=nrm((1, cout), 0.01),
        )

    def mlp(din, d0, d1, dout):
        return dict(
            w0=nrm((din, d0), 1.0 / np.sqrt(din)), b0=nrm((1, d0), 0.01),
            w1=nrm((d0, d1), 1.0 / np.sqrt(d0)), b1=nrm((1, d1), 0.01),
            w2=nrm((d1, dout), 1.0 / np.sqrt(d1)), b2=nrm((1, dout), 0.01),
        )

    return dict(
        tb1=tb(CX + NUM_STATIC, CH),
        tb2=tb(CH + SDIM, CH),
        tb3=tb(CH + SDIM, CH),
        tb4=tb(CH + SDIM, CH),
        static1=mlp(NUM_STATIC, SDIM, SDIM, SDIM),
        static2=mlp(NUM_STATIC, SDIM, SDIM, SDIM),
        static3=mlp(NUM_STATIC, SDIM, SDIM, SDIM),
        static=mlp(NUM_STATIC, SDIM, SDIM, SDIM),
        composite=mlp(CH + SDIM, CDIM, CDIM, 1),
        s_composite=mlp(NUM_STATIC, SCDIM, SCDIM, 1),
    )


# ---------------------------------- main --------------------------------------
if __name__ == "__main__":
    key = jax.random.PRNGKey(0)
    k_params, kx, ks = jax.random.split(key, 3)
    params = init_params(k_params)

    # PyTorch-style inputs: x is NCW (B, C, T); s is (B, num_static)
    x = jax.random.normal(kx, (B, CX, T), dtype=jnp.float32)
    s = jax.random.normal(ks, (B, NUM_STATIC), dtype=jnp.float32)

    slab, layout = pack_params(params)                 # one-time host-side packing
    fwd = jax.jit(functools.partial(forward, layout=layout))
    out = jax.block_until_ready(fwd(slab, x, s))
    assert out.shape == (B, T, 1), out.shape

    ref = forward_ref(params, x, s)
    err = float(jnp.max(jnp.abs(out - ref)))
    if not np.isfinite(err) or err > 5e-3:
        raise AssertionError(f"mismatch vs pure-JAX reference: max abs err = {err}")

    print("KERNEL_OK")
</pallas_src>

<mosaic_0001>
module attributes {stable_mosaic.version = 11 : i64} {
  func.func @fused_forward_kernel(%arg0: memref<48x16xf32, #tpu.memory_space<vmem>>, %arg1: memref<560x128xf32, #tpu.memory_space<vmem>>, %arg2: memref<48x1xf32, #tpu.memory_space<vmem>>) attributes {dimension_semantics = [], scalar_prefetch = 0 : i64, scratch_operands = 0 : i64, tpu.core_type = #tpu.core_type<tc>} {
    %c0 = arith.constant 0 : index
    %c0_0 = arith.constant 0 : index
    %0 = vector.load %arg0[%c0, %c0_0] : memref<48x16xf32, #tpu.memory_space<vmem>>, vector<48x16xf32>
    %1 = vector.extract_strided_slice %0 {offsets = [0, 8], sizes = [48, 8], strides = [1, 1]} : vector<48x16xf32> to vector<48x8xf32>
    %c0_1 = arith.constant 0 : index
    %c0_2 = arith.constant 0 : index
    %2 = vector.load %arg1[%c0_1, %c0_2] : memref<560x128xf32, #tpu.memory_space<vmem>>, vector<48x16xf32>
    %c48 = arith.constant 48 : index
    %c0_3 = arith.constant 0 : index
    %3 = vector.load %arg1[%c48, %c0_3] : memref<560x128xf32, #tpu.memory_space<vmem>>, vector<8x80xf32>
    %cst = arith.constant dense<0.000000e+00> : vector<48x80xf32>
    %4 = tpu.matmul %1, %3, %cst {dimension_numbers = #tpu.dot_dimension_numbers<[1], [0], [0], [1], [0, 0, 1, 1], [], []>} : vector<48x8xf32>, vector<8x80xf32>, vector<48x80xf32> -> vector<48x80xf32>
    %c56 = arith.constant 56 : index
    %c0_4 = arith.constant 0 : index
    %5 = vector.load %arg1[%c56, %c0_4] : memref<560x128xf32, #tpu.memory_space<vmem>>, vector<1x80xf32>
    %6 = vector.broadcast %5 : vector<1x80xf32> to vector<48x80xf32>
    %7 = arith.addf %4, %6 : vector<48x80xf32>
    %cst_5 = arith.constant 0.000000e+00 : f32
    %8 = vector.broadcast %cst_5 : f32 to vector<48x80xf32>
    %9 = arith.maximumf %7, %8 : vector<48x80xf32>
    %c64 = arith.constant 64 : index
    %c0_6 = arith.constant 0 : index
    %10 = vector.load %arg1[%c64, %c0_6] : memref<560x128xf32, #tpu.memory_space<vmem>>, vector<80x80xf32>
    %cst_7 = arith.constant dense<0.000000e+00> : vector<48x80xf32>
    %11 = tpu.matmul %9, %10, %cst_7 {dimension_numbers = #tpu.dot_dimension_numbers<[1], [0], [0], [1], [0, 0, 1, 1], [], []>} : vector<48x80xf32>, vector<80x80xf32>, vector<48x80xf32> -> vector<48x80xf32>
    %c144 = arith.constant 144 : index
    %c0_8 = arith.constant 0 : index
    %12 = vector.load %arg1[%c144, %c0_8] : memref<560x128xf32, #tpu.memory_space<vmem>>, vector<1x80xf32>
    %13 = vector.broadcast %12 : vector<1x80xf32> to vector<48x80xf32>
    %14 = arith.addf %11, %13 : vector<48x80xf32>
    %cst_9 = arith.constant 0.000000e+00 : f32
    %15 = vector.broadcast %cst_9 : f32 to vector<48x80xf32>
    %16 = arith.maximumf %14, %15 : vector<48x80xf32>
    %c152 = arith.constant 152 : index
    %c0_10 = arith.constant 0 : index
    %17 = vector.load %arg1[%c152, %c0_10] : memref<560x128xf32, #tpu.memory_space<vmem>>, vector<80x80xf32>
    %cst_11 = arith.constant dense<0.000000e+00> : vector<48x80xf32>
    %18 = tpu.matmul %16, %17, %cst_11 {dimension_numbers = #tpu.dot_dimension_numbers<[1], [0], [0], [1], [0, 0, 1, 1], [], []>} : vector<48x80xf32>, vector<80x80xf32>, vector<48x80xf32> -> vector<48x80xf32>
    %c232 = arith.constant 232 : index
    %c0_12 = arith.constant 0 : index
    %19 = vector.load %arg1[%c232, %c0_12] : memref<560x128xf32, #tpu.memory_space<vmem>>, vector<1x80xf32>
    %20 = vector.broadcast %19 : vector<1x80xf32> to vector<48x80xf32>
    %21 = arith.addf %18, %20 : vector<48x80xf32>
    %c240 = arith.constant 240 : index
    %c0_13 = arith.constant 0 : index
    %22 = vector.load %arg1[%c240, %c0_13] : memref<560x128xf32, #tpu.memory_space<vmem>>, vector<16x64xf32>
    %cst_14 = arith.constant dense<0.000000e+00> : vector<48x64xf32>
    %23 = tpu.matmul %0, %22, %cst_14 {dimension_numbers = #tpu.dot_dimension_numbers<[1], [0], [0], [1], [0, 0, 1, 1], [], []>} : vector<48x16xf32>, vector<16x64xf32>, vector<48x64xf32> -> vector<48x64xf32>
    %c264 = arith.constant 264 : index
    %c0_15 = arith.constant 0 : index
    %24 = vector.load %arg1[%c264, %c0_15] : memref<560x128xf32, #tpu.memory_space<vmem>>, vector<16x48xf32>
    %c256 = arith.constant 256 : index
    %c0_16 = arith.constant 0 : index
    %25 = vector.load %arg1[%c256, %c0_16] : memref<560x128xf32, #tpu.memory_space<vmem>>, vector<1x32xf32>
    %c280 = arith.constant 280 : index
    %c0_17 = arith.constant 0 : index
    %26 = vector.load %arg1[%c280, %c0_17] : memref<560x128xf32, #tpu.memory_space<vmem>>, vector<1x16xf32>
    %27 = vector.extract_strided_slice %25 {offsets = [0, 0], sizes = [1, 16], strides = [1, 1]} : vector<1x32xf32> to vector<1x16xf32>
    %28 = vector.extract_strided_slice %23 {offsets = [0, 0], sizes = [48, 16], strides = [1, 1]} : vector<48x64xf32> to vector<48x16xf32>
    %c2_i32 = arith.constant 2 : i32
    %29 = tpu.dynamic_rotate %28 by %c2_i32 dim 0 : vector<48x16xf32>, i32 -> vector<48x16xf32>
    %cst_18 = arith.constant 2.000000e+00 : f32
    %30 = vector.broadcast %cst_18 : f32 to vector<48x16xf32>
    %31 = arith.cmpf oge, %2, %30 : vector<48x16xf32>
    %cst_19 = arith.constant 0.000000e+00 : f32
    %32 = vector.broadcast %cst_19 : f32 to vector<48x16xf32>
    %33 = arith.select %31, %29, %32 : vector<48x16xi1>, vector<48x16xf32>
    %34 = vector.extract_strided_slice %23 {offsets = [0, 16], sizes = [48, 16], strides = [1, 1]} : vector<48x64xf32> to vector<48x16xf32>
    %c1_i32 = arith.constant 1 : i32
    %35 = tpu.dynamic_rotate %34 by %c1_i32 dim 0 : vector<48x16xf32>, i32 -> vector<48x16xf32>
    %cst_20 = arith.constant 1.000000e+00 : f32
    %36 = vector.broadcast %cst_20 : f32 to vector<48x16xf32>
    %37 = arith.cmpf oge, %2, %36 : vector<48x16xf32>
    %cst_21 = arith.constant 0.000000e+00 : f32
    %38 = vector.broadcast %cst_21 : f32 to vector<48x16xf32>
    %39 = arith.select %37, %35, %38 : vector<48x16xi1>, vector<48x16xf32>
    %40 = arith.addf %33, %39 : vector<48x16xf32>
    %41 = vector.extract_strided_slice %23 {offsets = [0, 32], sizes = [48, 16], strides = [1, 1]} : vector<48x64xf32> to vector<48x16xf32>
    %42 = arith.addf %40, %41 : vector<48x16xf32>
    %43 = vector.broadcast %27 : vector<1x16xf32> to vector<48x16xf32>
    %44 = arith.addf %42, %43 : vector<48x16xf32>
    %cst_22 = arith.constant 0.000000e+00 : f32
    %45 = vector.broadcast %cst_22 : f32 to vector<48x16xf32>
    %46 = arith.maximumf %44, %45 : vector<48x16xf32>
    %47 = vector.extract_strided_slice %23 {offsets = [0, 48], sizes = [48, 16], strides = [1, 1]} : vector<48x64xf32> to vector<48x16xf32>
    %48 = vector.extract_strided_slice %25 {offsets = [0, 16], sizes = [1, 16], strides = [1, 1]} : vector<1x32xf32> to vector<1x16xf32>
    %49 = vector.broadcast %48 : vector<1x16xf32> to vector<48x16xf32>
    %50 = arith.addf %47, %49 : vector<48x16xf32>
    %cst_23 = arith.constant dense<0.000000e+00> : vector<48x48xf32>
    %51 = tpu.matmul %46, %24, %cst_23 {dimension_numbers = #tpu.dot_dimension_numbers<[1], [0], [0], [1], [0, 0, 1, 1], [], []>} : vector<48x16xf32>, vector<16x48xf32>, vector<48x48xf32> -> vector<48x48xf32>
    %52 = vector.extract_strided_slice %51 {offsets = [0, 0], sizes = [48, 16], strides = [1, 1]} : vector<48x48xf32> to vector<48x16xf32>
    %c2_i32_24 = arith.constant 2 : i32
    %53 = tpu.dynamic_rotate %52 by %c2_i32_24 dim 0 : vector<48x16xf32>, i32 -> vector<48x16xf32>
    %cst_25 = arith.constant 2.000000e+00 : f32
    %54 = vector.broadcast %cst_25 : f32 to vector<48x16xf32>
    %55 = arith.cmpf oge, %2, %54 : vector<48x16xf32>
    %cst_26 = arith.constant 0.000000e+00 : f32
    %56 = vector.broadcast %cst_26 : f32 to vector<48x16xf32>
    %57 = arith.select %55, %53, %56 : vector<48x16xi1>, vector<48x16xf32>
    %58 = vector.extract_strided_slice %51 {offsets = [0, 16], sizes = [48, 16], strides = [1, 1]} : vector<48x48xf32> to vector<48x16xf32>
    %c1_i32_27 = arith.constant 1 : i32
    %59 = tpu.dynamic_rotate %58 by %c1_i32_27 dim 0 : vector<48x16xf32>, i32 -> vector<48x16xf32>
    %cst_28 = arith.constant 1.000000e+00 : f32
    %60 = vector.broadcast %cst_28 : f32 to vector<48x16xf32>
    %61 = arith.cmpf oge, %2, %60 : vector<48x16xf32>
    %cst_29 = arith.constant 0.000000e+00 : f32
    %62 = vector.broadcast %cst_29 : f32 to vector<48x16xf32>
    %63 = arith.select %61, %59, %62 : vector<48x16xi1>, vector<48x16xf32>
    %64 = arith.addf %57, %63 : vector<48x16xf32>
    %65 = vector.extract_strided_slice %51 {offsets = [0, 32], sizes = [48, 16], strides = [1, 1]} : vector<48x48xf32> to vector<48x16xf32>
    %66 = arith.addf %64, %65 : vector<48x16xf32>
    %67 = vector.broadcast %26 : vector<1x16xf32> to vector<48x16xf32>
    %68 = arith.addf %66, %67 : vector<48x16xf32>
    %cst_30 = arith.constant 0.000000e+00 : f32
    %69 = vector.broadcast %cst_30 : f32 to vector<48x16xf32>
    %70 = arith.maximumf %68, %69 : vector<48x16xf32>
    %71 = arith.addf %70, %50 : vector<48x16xf32>
    %cst_31 = arith.constant 0.000000e+00 : f32
    %72 = vector.broadcast %cst_31 : f32 to vector<48x16xf32>
    %73 = arith.maximumf %71, %72 : vector<48x16xf32>
    %74 = vector.extract_strided_slice %21 {offsets = [0, 0], sizes = [48, 16], strides = [1, 1]} : vector<48x80xf32> to vector<48x16xf32>
    %c288 = arith.constant 288 : index
    %c0_32 = arith.constant 0 : index
    %75 = vector.load %arg1[%c288, %c0_32] : memref<560x128xf32, #tpu.memory_space<vmem>>, vector<16x64xf32>
    %cst_33 = arith.constant dense<0.000000e+00> : vector<48x64xf32>
    %76 = tpu.matmul %73, %75, %cst_33 {dimension_numbers = #tpu.dot_dimension_numbers<[1], [0], [0], [1], [0, 0, 1, 1], [], []>} : vector<48x16xf32>, vector<16x64xf32>, vector<48x64xf32> -> vector<48x64xf32>
    %c304 = arith.constant 304 : index
    %c0_34 = arith.constant 0 : index
    %77 = vector.load %arg1[%c304, %c0_34] : memref<560x128xf32, #tpu.memory_space<vmem>>, vector<16x64xf32>
    %cst_35 = arith.constant dense<0.000000e+00> : vector<48x64xf32>
    %78 = tpu.matmul %74, %77, %cst_35 {dimension_numbers = #tpu.dot_dimension_numbers<[1], [0], [0], [1], [0, 0, 1, 1], [], []>} : vector<48x16xf32>, vector<16x64xf32>, vector<48x64xf32> -> vector<48x64xf32>
    %79 = arith.addf %76, %78 : vector<48x64xf32>
    %c328 = arith.constant 328 : index
    %c0_36 = arith.constant 0 : index
    %80 = vector.load %arg1[%c328, %c0_36] : memref<560x128xf32, #tpu.memory_space<vmem>>, vector<16x48xf32>
    %c320 = arith.constant 320 : index
    %c0_37 = arith.constant 0 : index
    %81 = vector.load %arg1[%c320, %c0_37] : memref<560x128xf32, #tpu.memory_space<vmem>>, vector<1x32xf32>
    %c344 = arith.constant 344 : index
    %c0_38 = arith.constant 0 : index
    %82 = vector.load %arg1[%c344, %c0_38] : memref<560x128xf32, #tpu.memory_space<vmem>>, vector<1x16xf32>
    %83 = vector.extract_strided_slice %81 {offsets = [0, 0], sizes = [1, 16], strides = [1, 1]} : vector<1x32xf32> to vector<1x16xf32>
    %84 = vector.extract_strided_slice %79 {offsets = [0, 0], sizes = [48, 16], strides = [1, 1]} : vector<48x64xf32> to vector<48x16xf32>
    %c4_i32 = arith.constant 4 : i32
    %85 = tpu.dynamic_rotate %84 by %c4_i32 dim 0 : vector<48x16xf32>, i32 -> vector<48x16xf32>
    %cst_39 = arith.constant 4.000000e+00 : f32
    %86 = vector.broadcast %cst_39 : f32 to vector<48x16xf32>
    %87 = arith.cmpf oge, %2, %86 : vector<48x16xf32>
    %cst_40 = arith.constant 0.000000e+00 : f32
    %88 = vector.broadcast %cst_40 : f32 to vector<48x16xf32>
    %89 = arith.select %87, %85, %88 : vector<48x16xi1>, vector<48x16xf32>
    %90 = vector.extract_strided_slice %79 {offsets = [0, 16], sizes = [48, 16], strides = [1, 1]} : vector<48x64xf32> to vector<48x16xf32>
    %c2_i32_41 = arith.constant 2 : i32
    %91 = tpu.dynamic_rotate %90 by %c2_i32_41 dim 0 : vector<48x16xf32>, i32 -> vector<48x16xf32>
    %cst_42 = arith.constant 2.000000e+00 : f32
    %92 = vector.broadcast %cst_42 : f32 to vector<48x16xf32>
    %93 = arith.cmpf oge, %2, %92 : vector<48x16xf32>
    %cst_43 = arith.constant 0.000000e+00 : f32
    %94 = vector.broadcast %cst_43 : f32 to vector<48x16xf32>
    %95 = arith.select %93, %91, %94 : vector<48x16xi1>, vector<48x16xf32>
    %96 = arith.addf %89, %95 : vector<48x16xf32>
    %97 = vector.extract_strided_slice %79 {offsets = [0, 32], sizes = [48, 16], strides = [1, 1]} : vector<48x64xf32> to vector<48x16xf32>
    %98 = arith.addf %96, %97 : vector<48x16xf32>
    %99 = vector.broadcast %83 : vector<1x16xf32> to vector<48x16xf32>
    %100 = arith.addf %98, %99 : vector<48x16xf32>
    %cst_44 = arith.constant 0.000000e+00 : f32
    %101 = vector.broadcast %cst_44 : f32 to vector<48x16xf32>
    %102 = arith.maximumf %100, %101 : vector<48x16xf32>
    %103 = vector.extract_strided_slice %79 {offsets = [0, 48], sizes = [48, 16], strides = [1, 1]} : vector<48x64xf32> to vector<48x16xf32>
    %104 = vector.extract_strided_slice %81 {offsets = [0, 16], sizes = [1, 16], strides = [1, 1]} : vector<1x32xf32> to vector<1x16xf32>
    %105 = vector.broadcast %104 : vector<1x16xf32> to vector<48x16xf32>
    %106 = arith.addf %103, %105 : vector<48x16xf32>
    %cst_45 = arith.constant dense<0.000000e+00> : vector<48x48xf32>
    %107 = tpu.matmul %102, %80, %cst_45 {dimension_numbers = #tpu.dot_dimension_numbers<[1], [0], [0], [1], [0, 0, 1, 1], [], []>} : vector<48x16xf32>, vector<16x48xf32>, vector<48x48xf32> -> vector<48x48xf32>
    %108 = vector.extract_strided_slice %107 {offsets = [0, 0], sizes = [48, 16], strides = [1, 1]} : vector<48x48xf32> to vector<48x16xf32>
    %c4_i32_46 = arith.constant 4 : i32
    %109 = tpu.dynamic_rotate %108 by %c4_i32_46 dim 0 : vector<48x16xf32>, i32 -> vector<48x16xf32>
    %cst_47 = arith.constant 4.000000e+00 : f32
    %110 = vector.broadcast %cst_47 : f32 to vector<48x16xf32>
    %111 = arith.cmpf oge, %2, %110 : vector<48x16xf32>
    %cst_48 = arith.constant 0.000000e+00 : f32
    %112 = vector.broadcast %cst_48 : f32 to vector<48x16xf32>
    %113 = arith.select %111, %109, %112 : vector<48x16xi1>, vector<48x16xf32>
    %114 = vector.extract_strided_slice %107 {offsets = [0, 16], sizes = [48, 16], strides = [1, 1]} : vector<48x48xf32> to vector<48x16xf32>
    %c2_i32_49 = arith.constant 2 : i32
    %115 = tpu.dynamic_rotate %114 by %c2_i32_49 dim 0 : vector<48x16xf32>, i32 -> vector<48x16xf32>
    %cst_50 = arith.constant 2.000000e+00 : f32
    %116 = vector.broadcast %cst_50 : f32 to vector<48x16xf32>
    %117 = arith.cmpf oge, %2, %116 : vector<48x16xf32>
    %cst_51 = arith.constant 0.000000e+00 : f32
    %118 = vector.broadcast %cst_51 : f32 to vector<48x16xf32>
    %119 = arith.select %117, %115, %118 : vector<48x16xi1>, vector<48x16xf32>
    %120 = arith.addf %113, %119 : vector<48x16xf32>
    %121 = vector.extract_strided_slice %107 {offsets = [0, 32], sizes = [48, 16], strides = [1, 1]} : vector<48x48xf32> to vector<48x16xf32>
    %122 = arith.addf %120, %121 : vector<48x16xf32>
    %123 = vector.broadcast %82 : vector<1x16xf32> to vector<48x16xf32>
    %124 = arith.addf %122, %123 : vector<48x16xf32>
    %cst_52 = arith.constant 0.000000e+00 : f32
    %125 = vector.broadcast %cst_52 : f32 to vector<48x16xf32>
    %126 = arith.maximumf %124, %125 : vector<48x16xf32>
    %127 = arith.addf %126, %106 : vector<48x16xf32>
    %cst_53 = arith.constant 0.000000e+00 : f32
    %128 = vector.broadcast %cst_53 : f32 to vector<48x16xf32>
    %129 = arith.maximumf %127, %128 : vector<48x16xf32>
    %130 = vector.extract_strided_slice %21 {offsets = [0, 16], sizes = [48, 16], strides = [1, 1]} : vector<48x80xf32> to vector<48x16xf32>
    %c352 = arith.constant 352 : index
    %c0_54 = arith.constant 0 : index
    %131 = vector.load %arg1[%c352, %c0_54] : memref<560x128xf32, #tpu.memory_space<vmem>>, vector<16x64xf32>
    %cst_55 = arith.constant dense<0.000000e+00> : vector<48x64xf32>
    %132 = tpu.matmul %129, %131, %cst_55 {dimension_numbers = #tpu.dot_dimension_numbers<[1], [0], [0], [1], [0, 0, 1, 1], [], []>} : vector<48x16xf32>, vector<16x64xf32>, vector<48x64xf32> -> vector<48x64xf32>
    %c368 = arith.constant 368 : index
    %c0_56 = arith.constant 0 : index
    %133 = vector.load %arg1[%c368, %c0_56] : memref<560x128xf32, #tpu.memory_space<vmem>>, vector<16x64xf32>
    %cst_57 = arith.constant dense<0.000000e+00> : vector<48x64xf32>
    %134 = tpu.matmul %130, %133, %cst_57 {dimension_numbers = #tpu.dot_dimension_numbers<[1], [0], [0], [1], [0, 0, 1, 1], [], []>} : vector<48x16xf32>, vector<16x64xf32>, vector<48x64xf32> -> vector<48x64xf32>
    %135 = arith.addf %132, %134 : vector<48x64xf32>
    %c392 = arith.constant 392 : index
    %c0_58 = arith.constant 0 : index
    %136 = vector.load %arg1[%c392, %c0_58] : memref<560x128xf32, #tpu.memory_space<vmem>>, vector<16x48xf32>
    %c384 = arith.constant 384 : index
    %c0_59 = arith.constant 0 : index
    %137 = vector.load %arg1[%c384, %c0_59] : memref<560x128xf32, #tpu.memory_space<vmem>>, vector<1x32xf32>
    %c408 = arith.constant 408 : index
    %c0_60 = arith.constant 0 : index
    %138 = vector.load %arg1[%c408, %c0_60] : memref<560x128xf32, #tpu.memory_space<vmem>>, vector<1x16xf32>
    %139 = vector.extract_strided_slice %137 {offsets = [0, 0], sizes = [1, 16], strides = [1, 1]} : vector<1x32xf32> to vector<1x16xf32>
    %140 = vector.extract_strided_slice %135 {offsets = [0, 0], sizes = [48, 16], strides = [1, 1]} : vector<48x64xf32> to vector<48x16xf32>
    %c8_i32 = arith.constant 8 : i32
    %141 = tpu.dynamic_rotate %140 by %c8_i32 dim 0 : vector<48x16xf32>, i32 -> vector<48x16xf32>
    %cst_61 = arith.constant 8.000000e+00 : f32
    %142 = vector.broadcast %cst_61 : f32 to vector<48x16xf32>
    %143 = arith.cmpf oge, %2, %142 : vector<48x16xf32>
    %cst_62 = arith.constant 0.000000e+00 : f32
    %144 = vector.broadcast %cst_62 : f32 to vector<48x16xf32>
    %145 = arith.select %143, %141, %144 : vector<48x16xi1>, vector<48x16xf32>
    %146 = vector.extract_strided_slice %135 {offsets = [0, 16], sizes = [48, 16], strides = [1, 1]} : vector<48x64xf32> to vector<48x16xf32>
    %c4_i32_63 = arith.constant 4 : i32
    %147 = tpu.dynamic_rotate %146 by %c4_i32_63 dim 0 : vector<48x16xf32>, i32 -> vector<48x16xf32>
    %cst_64 = arith.constant 4.000000e+00 : f32
    %148 = vector.broadcast %cst_64 : f32 to vector<48x16xf32>
    %149 = arith.cmpf oge, %2, %148 : vector<48x16xf32>
    %cst_65 = arith.constant 0.000000e+00 : f32
    %150 = vector.broadcast %cst_65 : f32 to vector<48x16xf32>
    %151 = arith.select %149, %147, %150 : vector<48x16xi1>, vector<48x16xf32>
    %152 = arith.addf %145, %151 : vector<48x16xf32>
    %153 = vector.extract_strided_slice %135 {offsets = [0, 32], sizes = [48, 16], strides = [1, 1]} : vector<48x64xf32> to vector<48x16xf32>
    %154 = arith.addf %152, %153 : vector<48x16xf32>
    %155 = vector.broadcast %139 : vector<1x16xf32> to vector<48x16xf32>
    %156 = arith.addf %154, %155 : vector<48x16xf32>
    %cst_66 = arith.constant 0.000000e+00 : f32
    %157 = vector.broadcast %cst_66 : f32 to vector<48x16xf32>
    %158 = arith.maximumf %156, %157 : vector<48x16xf32>
    %159 = vector.extract_strided_slice %135 {offsets = [0, 48], sizes = [48, 16], strides = [1, 1]} : vector<48x64xf32> to vector<48x16xf32>
    %160 = vector.extract_strided_slice %137 {offsets = [0, 16], sizes = [1, 16], strides = [1, 1]} : vector<1x32xf32> to vector<1x16xf32>
    %161 = vector.broadcast %160 : vector<1x16xf32> to vector<48x16xf32>
    %162 = arith.addf %159, %161 : vector<48x16xf32>
    %cst_67 = arith.constant dense<0.000000e+00> : vector<48x48xf32>
    %163 = tpu.matmul %158, %136, %cst_67 {dimension_numbers = #tpu.dot_dimension_numbers<[1], [0], [0], [1], [0, 0, 1, 1], [], []>} : vector<48x16xf32>, vector<16x48xf32>, vector<48x48xf32> -> vector<48x48xf32>
    %164 = vector.extract_strided_slice %163 {offsets = [0, 0], sizes = [48, 16], strides = [1, 1]} : vector<48x48xf32> to vector<48x16xf32>
    %c8_i32_68 = arith.constant 8 : i32
    %165 = tpu.dynamic_rotate %164 by %c8_i32_68 dim 0 : vector<48x16xf32>, i32 -> vector<48x16xf32>
    %cst_69 = arith.constant 8.000000e+00 : f32
    %166 = vector.broadcast %cst_69 : f32 to vector<48x16xf32>
    %167 = arith.cmpf oge, %2, %166 : vector<48x16xf32>
    %cst_70 = arith.constant 0.000000e+00 : f32
    %168 = vector.broadcast %cst_70 : f32 to vector<48x16xf32>
    %169 = arith.select %167, %165, %168 : vector<48x16xi1>, vector<48x16xf32>
    %170 = vector.extract_strided_slice %163 {offsets = [0, 16], sizes = [48, 16], strides = [1, 1]} : vector<48x48xf32> to vector<48x16xf32>
    %c4_i32_71 = arith.constant 4 : i32
    %171 = tpu.dynamic_rotate %170 by %c4_i32_71 dim 0 : vector<48x16xf32>, i32 -> vector<48x16xf32>
    %cst_72 = arith.constant 4.000000e+00 : f32
    %172 = vector.broadcast %cst_72 : f32 to vector<48x16xf32>
    %173 = arith.cmpf oge, %2, %172 : vector<48x16xf32>
    %cst_73 = arith.constant 0.000000e+00 : f32
    %174 = vector.broadcast %cst_73 : f32 to vector<48x16xf32>
    %175 = arith.select %173, %171, %174 : vector<48x16xi1>, vector<48x16xf32>
    %176 = arith.addf %169, %175 : vector<48x16xf32>
    %177 = vector.extract_strided_slice %163 {offsets = [0, 32], sizes = [48, 16], strides = [1, 1]} : vector<48x48xf32> to vector<48x16xf32>
    %178 = arith.addf %176, %177 : vector<48x16xf32>
    %179 = vector.broadcast %138 : vector<1x16xf32> to vector<48x16xf32>
    %180 = arith.addf %178, %179 : vector<48x16xf32>
    %cst_74 = arith.constant 0.000000e+00 : f32
    %181 = vector.broadcast %cst_74 : f32 to vector<48x16xf32>
    %182 = arith.maximumf %180, %181 : vector<48x16xf32>
    %183 = arith.addf %182, %162 : vector<48x16xf32>
    %cst_75 = arith.constant 0.000000e+00 : f32
    %184 = vector.broadcast %cst_75 : f32 to vector<48x16xf32>
    %185 = arith.maximumf %183, %184 : vector<48x16xf32>
    %186 = vector.extract_strided_slice %21 {offsets = [0, 32], sizes = [48, 16], strides = [1, 1]} : vector<48x80xf32> to vector<48x16xf32>
    %c416 = arith.constant 416 : index
    %c0_76 = arith.constant 0 : index
    %187 = vector.load %arg1[%c416, %c0_76] : memref<560x128xf32, #tpu.memory_space<vmem>>, vector<16x64xf32>
    %cst_77 = arith.constant dense<0.000000e+00> : vector<48x64xf32>
    %188 = tpu.matmul %185, %187, %cst_77 {dimension_numbers = #tpu.dot_dimension_numbers<[1], [0], [0], [1], [0, 0, 1, 1], [], []>} : vector<48x16xf32>, vector<16x64xf32>, vector<48x64xf32> -> vector<48x64xf32>
    %c432 = arith.constant 432 : index
    %c0_78 = arith.constant 0 : index
    %189 = vector.load %arg1[%c432, %c0_78] : memref<560x128xf32, #tpu.memory_space<vmem>>, vector<16x64xf32>
    %cst_79 = arith.constant dense<0.000000e+00> : vector<48x64xf32>
    %190 = tpu.matmul %186, %189, %cst_79 {dimension_numbers = #tpu.dot_dimension_numbers<[1], [0], [0], [1], [0, 0, 1, 1], [], []>} : vector<48x16xf32>, vector<16x64xf32>, vector<48x64xf32> -> vector<48x64xf32>
    %191 = arith.addf %188, %190 : vector<48x64xf32>
    %c456 = arith.constant 456 : index
    %c0_80 = arith.constant 0 : index
    %192 = vector.load %arg1[%c456, %c0_80] : memref<560x128xf32, #tpu.memory_space<vmem>>, vector<16x48xf32>
    %c448 = arith.constant 448 : index
    %c0_81 = arith.constant 0 : index
    %193 = vector.load %arg1[%c448, %c0_81] : memref<560x128xf32, #tpu.memory_space<vmem>>, vector<1x32xf32>
    %c472 = arith.constant 472 : index
    %c0_82 = arith.constant 0 : index
    %194 = vector.load %arg1[%c472, %c0_82] : memref<560x128xf32, #tpu.memory_space<vmem>>, vector<1x16xf32>
    %195 = vector.extract_strided_slice %193 {offsets = [0, 0], sizes = [1, 16], strides = [1, 1]} : vector<1x32xf32> to vector<1x16xf32>
    %196 = vector.extract_strided_slice %191 {offsets = [0, 0], sizes = [48, 16], strides = [1, 1]} : vector<48x64xf32> to vector<48x16xf32>
    %c16_i32 = arith.constant 16 : i32
    %197 = tpu.dynamic_rotate %196 by %c16_i32 dim 0 : vector<48x16xf32>, i32 -> vector<48x16xf32>
    %cst_83 = arith.constant 1.600000e+01 : f32
    %198 = vector.broadcast %cst_83 : f32 to vector<48x16xf32>
    %199 = arith.cmpf oge, %2, %198 : vector<48x16xf32>
    %cst_84 = arith.constant 0.000000e+00 : f32
    %200 = vector.broadcast %cst_84 : f32 to vector<48x16xf32>
    %201 = arith.select %199, %197, %200 : vector<48x16xi1>, vector<48x16xf32>
    %202 = vector.extract_strided_slice %191 {offsets = [0, 16], sizes = [48, 16], strides = [1, 1]} : vector<48x64xf32> to vector<48x16xf32>
    %c8_i32_85 = arith.constant 8 : i32
    %203 = tpu.dynamic_rotate %202 by %c8_i32_85 dim 0 : vector<48x16xf32>, i32 -> vector<48x16xf32>
    %cst_86 = arith.constant 8.000000e+00 : f32
    %204 = vector.broadcast %cst_86 : f32 to vector<48x16xf32>
    %205 = arith.cmpf oge, %2, %204 : vector<48x16xf32>
    %cst_87 = arith.constant 0.000000e+00 : f32
    %206 = vector.broadcast %cst_87 : f32 to vector<48x16xf32>
    %207 = arith.select %205, %203, %206 : vector<48x16xi1>, vector<48x16xf32>
    %208 = arith.addf %201, %207 : vector<48x16xf32>
    %209 = vector.extract_strided_slice %191 {offsets = [0, 32], sizes = [48, 16], strides = [1, 1]} : vector<48x64xf32> to vector<48x16xf32>
    %210 = arith.addf %208, %209 : vector<48x16xf32>
    %211 = vector.broadcast %195 : vector<1x16xf32> to vector<48x16xf32>
    %212 = arith.addf %210, %211 : vector<48x16xf32>
    %cst_88 = arith.constant 0.000000e+00 : f32
    %213 = vector.broadcast %cst_88 : f32 to vector<48x16xf32>
    %214 = arith.maximumf %212, %213 : vector<48x16xf32>
    %215 = vector.extract_strided_slice %191 {offsets = [0, 48], sizes = [48, 16], strides = [1, 1]} : vector<48x64xf32> to vector<48x16xf32>
    %216 = vector.extract_strided_slice %193 {offsets = [0, 16], sizes = [1, 16], strides = [1, 1]} : vector<1x32xf32> to vector<1x16xf32>
    %217 = vector.broadcast %216 : vector<1x16xf32> to vector<48x16xf32>
    %218 = arith.addf %215, %217 : vector<48x16xf32>
    %cst_89 = arith.constant dense<0.000000e+00> : vector<48x48xf32>
    %219 = tpu.matmul %214, %192, %cst_89 {dimension_numbers = #tpu.dot_dimension_numbers<[1], [0], [0], [1], [0, 0, 1, 1], [], []>} : vector<48x16xf32>, vector<16x48xf32>, vector<48x48xf32> -> vector<48x48xf32>
    %220 = vector.extract_strided_slice %219 {offsets = [0, 0], sizes = [48, 16], strides = [1, 1]} : vector<48x48xf32> to vector<48x16xf32>
    %c16_i32_90 = arith.constant 16 : i32
    %221 = tpu.dynamic_rotate %220 by %c16_i32_90 dim 0 : vector<48x16xf32>, i32 -> vector<48x16xf32>
    %cst_91 = arith.constant 1.600000e+01 : f32
    %222 = vector.broadcast %cst_91 : f32 to vector<48x16xf32>
    %223 = arith.cmpf oge, %2, %222 : vector<48x16xf32>
    %cst_92 = arith.constant 0.000000e+00 : f32
    %224 = vector.broadcast %cst_92 : f32 to vector<48x16xf32>
    %225 = arith.select %223, %221, %224 : vector<48x16xi1>, vector<48x16xf32>
    %226 = vector.extract_strided_slice %219 {offsets = [0, 16], sizes = [48, 16], strides = [1, 1]} : vector<48x48xf32> to vector<48x16xf32>
    %c8_i32_93 = arith.constant 8 : i32
    %227 = tpu.dynamic_rotate %226 by %c8_i32_93 dim 0 : vector<48x16xf32>, i32 -> vector<48x16xf32>
    %cst_94 = arith.constant 8.000000e+00 : f32
    %228 = vector.broadcast %cst_94 : f32 to vector<48x16xf32>
    %229 = arith.cmpf oge, %2, %228 : vector<48x16xf32>
    %cst_95 = arith.constant 0.000000e+00 : f32
    %230 = vector.broadcast %cst_95 : f32 to vector<48x16xf32>
    %231 = arith.select %229, %227, %230 : vector<48x16xi1>, vector<48x16xf32>
    %232 = arith.addf %225, %231 : vector<48x16xf32>
    %233 = vector.extract_strided_slice %219 {offsets = [0, 32], sizes = [48, 16], strides = [1, 1]} : vector<48x48xf32> to vector<48x16xf32>
    %234 = arith.addf %232, %233 : vector<48x16xf32>
    %235 = vector.broadcast %194 : vector<1x16xf32> to vector<48x16xf32>
    %236 = arith.addf %234, %235 : vector<48x16xf32>
    %cst_96 = arith.constant 0.000000e+00 : f32
    %237 = vector.broadcast %cst_96 : f32 to vector<48x16xf32>
    %238 = arith.maximumf %236, %237 : vector<48x16xf32>
    %239 = arith.addf %238, %218 : vector<48x16xf32>
    %cst_97 = arith.constant 0.000000e+00 : f32
    %240 = vector.broadcast %cst_97 : f32 to vector<48x16xf32>
    %241 = arith.maximumf %239, %240 : vector<48x16xf32>
    %242 = vector.extract_strided_slice %21 {offsets = [0, 48], sizes = [48, 16], strides = [1, 1]} : vector<48x80xf32> to vector<48x16xf32>
    %c480 = arith.constant 480 : index
    %c0_98 = arith.constant 0 : index
    %243 = vector.load %arg1[%c480, %c0_98] : memref<560x128xf32, #tpu.memory_space<vmem>>, vector<16x16xf32>
    %cst_99 = arith.constant dense<0.000000e+00> : vector<48x16xf32>
    %244 = tpu.matmul %241, %243, %cst_99 {dimension_numbers = #tpu.dot_dimension_numbers<[1], [0], [0], [1], [0, 0, 1, 1], [], []>} : vector<48x16xf32>, vector<16x16xf32>, vector<48x16xf32> -> vector<48x16xf32>
    %c496 = arith.constant 496 : index
    %c0_100 = arith.constant 0 : index
    %245 = vector.load %arg1[%c496, %c0_100] : memref<560x128xf32, #tpu.memory_space<vmem>>, vector<16x16xf32>
    %cst_101 = arith.constant dense<0.000000e+00> : vector<48x16xf32>
    %246 = tpu.matmul %242, %245, %cst_101 {dimension_numbers = #tpu.dot_dimension_numbers<[1], [0], [0], [1], [0, 0, 1, 1], [], []>} : vector<48x16xf32>, vector<16x16xf32>, vector<48x16xf32> -> vector<48x16xf32>
    %247 = arith.addf %244, %246 : vector<48x16xf32>
    %c512 = arith.constant 512 : index
    %c0_102 = arith.constant 0 : index
    %248 = vector.load %arg1[%c512, %c0_102] : memref<560x128xf32, #tpu.memory_space<vmem>>, vector<1x16xf32>
    %249 = vector.broadcast %248 : vector<1x16xf32> to vector<48x16xf32>
    %250 = arith.addf %247, %249 : vector<48x16xf32>
    %cst_103 = arith.constant 0.000000e+00 : f32
    %251 = vector.broadcast %cst_103 : f32 to vector<48x16xf32>
    %252 = arith.maximumf %250, %251 : vector<48x16xf32>
    %c520 = arith.constant 520 : index
    %c0_104 = arith.constant 0 : index
    %253 = vector.load %arg1[%c520, %c0_104] : memref<560x128xf32, #tpu.memory_space<vmem>>, vector<16x16xf32>
    %cst_105 = arith.constant dense<0.000000e+00> : vector<48x16xf32>
    %254 = tpu.matmul %252, %253, %cst_105 {dimension_numbers = #tpu.dot_dimension_numbers<[1], [0], [0], [1], [0, 0, 1, 1], [], []>} : vector<48x16xf32>, vector<16x16xf32>, vector<48x16xf32> -> vector<48x16xf32>
    %c536 = arith.constant 536 : index
    %c0_106 = arith.constant 0 : index
    %255 = vector.load %arg1[%c536, %c0_106] : memref<560x128xf32, #tpu.memory_space<vmem>>, vector<1x16xf32>
    %256 = vector.broadcast %255 : vector<1x16xf32> to vector<48x16xf32>
    %257 = arith.addf %254, %256 : vector<48x16xf32>
    %cst_107 = arith.constant 0.000000e+00 : f32
    %258 = vector.broadcast %cst_107 : f32 to vector<48x16xf32>
    %259 = arith.maximumf %257, %258 : vector<48x16xf32>
    %c544 = arith.constant 544 : index
    %c0_108 = arith.constant 0 : index
    %260 = vector.load %arg1[%c544, %c0_108] : memref<560x128xf32, #tpu.memory_space<vmem>>, vector<1x16xf32>
    %261 = vector.broadcast %260 : vector<1x16xf32> to vector<48x16xf32>
    %262 = arith.mulf %259, %261 : vector<48x16xf32>
    %cst_109 = arith.constant dense<0.000000e+00> : vector<48xf32>
    %263 = vector.multi_reduction <add>, %262, %cst_109 [1] : vector<48x16xf32> to vector<48xf32>
    %264 = vector.shape_cast %263 : vector<48xf32> to vector<48x1xf32>
    %c552 = arith.constant 552 : index
    %c0_110 = arith.constant 0 : index
    %265 = vector.load %arg1[%c552, %c0_110] : memref<560x128xf32, #tpu.memory_space<vmem>>, vector<1x1xf32>
    %266 = vector.broadcast %265 : vector<1x1xf32> to vector<48x1xf32>
    %267 = arith.addf %264, %266 : vector<48x1xf32>
    %268 = vector.extract_strided_slice %21 {offsets = [0, 64], sizes = [48, 1], strides = [1, 1]} : vector<48x80xf32> to vector<48x1xf32>
    %269 = arith.addf %267, %268 : vector<48x1xf32>
    %c0_111 = arith.constant 0 : index
    %c0_112 = arith.constant 0 : index
    %270 = vector.load %arg2[%c0_111, %c0_112] : memref<48x1xf32, #tpu.memory_space<vmem>>, vector<48x1xf32>
    tpu.vector_store %arg2[%c0_111, %c0_112], %269 {strides = array<i32>} : memref<48x1xf32, #tpu.memory_space<vmem>>, vector<48x1xf32>,
    return
  }
}

</mosaic_0001>

<bundles_post_ra>
// kernel: forward.1
= control target key start
LH: loop header
LB: loop body
LE: loop exit
PB: predicated region body
PF: predicated region fallthrough
CT: control target
= control target key end

     0   :  { %7 = vsyncpa [#allocation3], 0  ;;  %s2265_s12 = smov [#allocation2]   ;;  %s2266_s14 = smov 128   ;;  %s3304_s0 = inlined_call_operand.vmem [shape: f32[48,16], index: 0, kind: input, shape index: {}]   ;;  %s3305_s1 = inlined_call_operand.hbm [shape: f32[560,128], index: 1, kind: input, shape index: {}]   ;;  %s3306_s2 = inlined_call_operand.vmem [shape: f32[48,1], index: 2, kind: output, shape index: {}]  }
   0x1   :  { %s14_s11 = sshll.u32 %s3305_s1, 4  ;;  %s16_s13 = sshll.u32 %s2265_s12, 4  ;;  %s15_s11 = int_to_ptr.hbm [resolvable:$true] %s14_s11  ;;  %s17_s13 = int_to_ptr.vmem [resolvable:$true] %s16_s13 }
   0x2   :  { %s2267_s15 = smov 8  }
   0x3   :  { %22 = dma.hbm_to_vmem [thread:$0]  %s15_s11, 8960, %s17_s13, [#allocation3], %s2266_s14, %s2266_s14, %s2267_s15  }
   0x4   :  { %2263 = dma.done.wait [#allocation3], 8960  }
   0x5   :  { %2264 = vsyncadd [#allocation3], 4294958336  ;;  %v32_v0 = vld [vmem:[%s3304_s0 + $0x28] sm:$0xff]  ;;  %v30_v1 = vld [vmem:[%s3304_s0 + $0x18] sm:$0xff]  ;;  %s2268_s20 = smov 120   ;;  %vm60_vm0 = vcmask 64512  }
   0x6   :  { %58 = vrot.lane.b32.xlu1 %v32_v0, %s2268_s20  ;;  %54 = vrot.lane.b32.xlu0 %v30_v1, %s2268_s20  ;;  %v28_v2 = vld [vmem:[%s3304_s0 + $0x8] sm:$0xff]  ;;  %v39_v3 = vld [vmem:[#allocation2 + $0x30] sm:$0xff]  ;;  %v31_v4 = vld [vmem:[%s3304_s0 + $0x20] sm:$0xff]  ;;  %vm253_vm1 = vcmask 130048   ;;  %vm126_vm2 = vcmask 654336   ;;  %s2270_s28 = smov 112  }
   0x7   :  { %50 = vrot.lane.b32.xlu2 %v28_v2, %s2268_s20  ;;  %2208 = vmatpush.msra.mxu3 %v39_v3  ;;  %v27_v5 = vld [vmem:[%s3304_s0] sm:$0xff]  ;;  %v29_v6 = vld [vmem:[%s3304_s0 + $0x10] sm:$0xff]  ;;  %v252_v7 = vld [vmem:[#allocation2 + $0xf8] sm:$0xff]  ;;  %s2269_s0 = smov 96   ;;  %s2271_s29 = smov 32  }
   0x8   :  { %88 = vmatpush.msra.mxu0 %v39_v3  ;;  %2207 = vmatpush.msra.mxu1 %v39_v3  ;;  %v251_v8 = vld [vmem:[#allocation2 + $0xf0] sm:$0xff]  ;;  %v123_v15 = vld [vmem:[#allocation2 + $0x88] sm:$0xff]  ;;  %v122_v16 = vld [vmem:[#allocation2 + $0x80] sm:$0xff]  ;;  %s2272_s30 = smov 80   ;;  %s2273_s3 = smov 64  }
   0x9   :  { %280 = vmatpush.msrb.mxu3 %v252_v7  ;;  %v121_v17 = vld [vmem:[#allocation2 + $0x78] sm:$0xff]  ;;  %v120_v18 = vld [vmem:[#allocation2 + $0x70] sm:$0xff]  ;;  %v119_v19 = vld [vmem:[#allocation2 + $0x68] sm:$0xff] }
   0xa   :  { %151 = vmatpush.msrb.mxu1 %v123_v15  ;;  %v118_v20 = vld [vmem:[#allocation2 + $0x60] sm:$0xff]  ;;  %v117_v21 = vld [vmem:[#allocation2 + $0x58] sm:$0xff]  ;;  %v116_v22 = vld [vmem:[#allocation2 + $0x50] sm:$0xff] }
   0xb   :  { %281 = vmatpush.msrb.mxu3 %v251_v8  ;;  %v115_v23 = vld [vmem:[#allocation2 + $0x48] sm:$0xff]  ;;  %v114_v24 = vld [vmem:[#allocation2 + $0x40] sm:$0xff]  ;;  %v2218_v26 = vld [vmem:[#allocation2 + $0x38] ss:$0 sm:$0xff] }
   0xc   :  { %152 = vmatpush.msrb.mxu1 %v122_v16  ;;  %v2346_v49 = vld [vmem:[#allocation2 + $0x100] ss:$0 sm:$0xff]  ;;  %v194_v52 = vld [vmem:[#allocation2 + $0xd8] sm:$0xff]  ;;  %v193_v53 = vld [vmem:[#allocation2 + $0xd0] sm:$0xff]  ;;  %v311_v16 = vlaneseq }
   0xd   :  { %v195_v51 = vld [vmem:[#allocation2 + $0xe0] sm:$0xff]  ;;  %v192_v54 = vld [vmem:[#allocation2 + $0xc8] sm:$0xff]  ;;  %v190_v56 = vld [vmem:[#allocation2 + $0xb8] sm:$0xff] }
   0xe   :  { %56 = vrot.lane.b32.xlu0 %v31_v4, %s2268_s20  ;;  %48 = vrot.lane.b32.xlu1 %v27_v5, %s2268_s20  ;;  %v191_v55 = vld [vmem:[#allocation2 + $0xc0] sm:$0xff]  ;;  %v189_v57 = vld [vmem:[#allocation2 + $0xb0] sm:$0xff]  ;;  %v188_v58 = vld [vmem:[#allocation2 + $0xa8] sm:$0xff] }
   0xf   :  { %52 = vrot.lane.b32.xlu2 %v29_v6, %s2268_s20  ;;  %153 = vmatpush.msrb.mxu1 %v121_v17  ;;  %v187_v59 = vld [vmem:[#allocation2 + $0xa0] sm:$0xff]  ;;  %v186_v60 = vld [vmem:[#allocation2 + $0x98] sm:$0xff]  ;;  %v2220_v61 = vld [vmem:[#allocation2 + $0x90] ss:$0 sm:$0xff] }
  0x10   :  { %222 = vmatpush.msra.mxu2 %v195_v51  ;;  %v302_v7 = vld [vmem:[#allocation2 + $0x110] sm:$0xff] }
  0x11   :  { %154 = vmatpush.msrb.mxu1 %v120_v18  ;;  %466 = vmatpush.msrb.mxu0 %v302_v7 }
  0x12   :  { %223 = vmatpush.msra.mxu2 %v194_v52 }
  0x13   :  { %155 = vmatpush.msrb.mxu1 %v119_v19 }
  0x14   :  { %224 = vmatpush.msra.mxu2 %v193_v53 }
  0x15   :  { %156 = vmatpush.msrb.mxu1 %v118_v20 }
  0x16   :  { %225 = vmatpush.msra.mxu2 %v192_v54 }
  0x17   :  { %157 = vmatpush.msrb.mxu1 %v117_v21  ;;  %v2367_v21 = vshrl.u32 %v311_v16, 7 }
  0x18   :  { %226 = vmatpush.msra.mxu2 %v191_v55  ;;  %v2408_v55 = vld [vmem:[#allocation2 + $0x10] sm:$0xff] }
  0x19   :  { %158 = vmatpush.msrb.mxu1 %v116_v22  ;;  %vm313_vm3 = vcmp.lt.s32.totalorder %v2367_v21, 2  ;;  %vm362_vm4 = vcmp.lt.s32.totalorder %v2367_v21, 1  ;;  %vm371_vm9 = vcmp.ge.f32.partialorder %v2408_v55, 1.0  ;;  %vm322_vm10 = vcmp.ge.f32.partialorder %v2408_v55, 2.0 }
  0x1a   :  { %227 = vmatpush.msra.mxu2 %v190_v56 }
  0x1b   :  { %159 = vmatpush.msrb.mxu1 %v115_v23  ;;  %v2371_v23 = vld [vmem:[#allocation2] sm:$0xff] }
  0x1c   :  { %228 = vmatpush.msra.mxu2 %v189_v57  ;;  %vm320_vm5 = vcmp.ge.f32.partialorder %v2371_v23, 2.0  ;;  %vm369_vm6 = vcmp.ge.f32.partialorder %v2371_v23, 1.0 }
  0x1d   :  { %160 = vmatpush.msrb.mxu1 %v114_v24 }
  0x1e   :  { %229 = vmatpush.msra.mxu2 %v188_v58 }
  0x20   :  { %230 = vmatpush.msra.mxu2 %v187_v59 }
  0x22   :  { %231 = vmatpush.msra.mxu2 %v186_v60 }
  0x61   :  { %v51_v9 = vpop.permute.xlu2 %50 }
  0x62   :  { %2106 = vmatmul.msk.f32.vlgmr.msra.gmra.mxu1 %vm60_vm0, %v51_v9 }
  0x69   :  { %v53_v10 = vpop.permute.xlu2 %52 }
  0x6a   :  { %2107 = vmatmul.msk.f32.gmra.mxu1 %vm60_vm0, %v53_v10 }
  0x78   :  { %v59_v11 = vpop.permute.xlu1 %58  ;;  %v55_v12 = vpop.permute.xlu0 %54 }
  0x79   :  { %2108 = vmatmul.msk.f32.vlgmr.msra.gmra.mxu3 %vm60_vm0, %v55_v12 }
  0x80   :  { %v57_v13 = vpop.permute.xlu0 %56  ;;  %v49_v14 = vpop.permute.xlu1 %48 }
  0x81   :  { %2105 = vmatmul.msk.f32.vlgmr.msra.gmra.mxu0 %vm60_vm0, %v49_v14  ;;  %2109 = vmatmul.msk.f32.gmra.mxu3 %vm60_vm0, %v57_v13 }
  0x89   :  { %2110 = vmatmul.msk.f32.gmra.mxu3 %vm60_vm0, %v59_v11  ;;  %v301_v11 = vld [vmem:[#allocation2 + $0x108] sm:$0xff] }
  0x8a   :  { %467 = vmatpush.msrb.mxu0 %v301_v11 }
  0x91   :  { %2123 = vmatmul.msk.f32.vlgmr.msrb.gmra.mxu3 %vm253_vm1, %v27_v5 }
  0x99   :  { %2124 = vmatmul.msk.f32.gmra.mxu3 %vm253_vm1, %v28_v2 }
  0xa1   :  { %2125 = vmatmul.msk.f32.gmra.mxu3 %vm253_vm1, %v29_v6 }
  0xa9   :  { %2126 = vmatmul.msk.f32.gmra.mxu3 %vm253_vm1, %v30_v1 }
  0xb1   :  { %2127 = vmatmul.msk.f32.gmra.mxu3 %vm253_vm1, %v31_v4 }
  0xb9   :  { %2128 = vmatmul.msk.f32.gmra.mxu3 %vm253_vm1, %v32_v0 }
  0xdf   :  { %v93_v28 = vpop.f32.mrf.mxu1 }
  0xe0   :  { %v94_v31 = vadd.f32 %v2218_v26, %v93_v28 }
  0xe2   :  { %v109_v33 = vmax.f32 %v94_v31, 0.0 }
  0xe7   :  { %v96_v34 = vpop.f32.mrf.mxu1 }
  0xe8   :  { %v97_v35 = vadd.f32 %v2218_v26, %v96_v34 }
  0xea   :  { %v110_v37 = vmax.f32 %v97_v35, 0.0 }
  0xfc   :  { %v99_v25 = vpop.f32.mrf.mxu3 }
  0xfd   :  { %v100_v39 = vadd.f32 %v2218_v26, %v99_v25 }
  0xfe   :  { %v90_v27 = vpop.f32.mrf.mxu0 }
  0xff   :  { %v91_v29 = vadd.f32 %v2218_v26, %v90_v27  ;;  %v111_v40 = vmax.f32 %v100_v39, 0.0 }
 0x101   :  { %v108_v30 = vmax.f32 %v91_v29, 0.0 }
 0x103   :  { %2111 = vmatmul.msk.f32.vlgmr.msrb.gmra.mxu1 %vm126_vm2, %v108_v30 }
 0x104   :  { %v102_v32 = vpop.f32.mrf.mxu3 }
 0x105   :  { %v103_v42 = vadd.f32 %v2218_v26, %v102_v32  ;;  %v2386_v32 = vld [vmem:[#allocation2 + $0x8] sm:$0xff] }
 0x106   :  { %vm370_vm7 = vcmp.ge.f32.partialorder %v2386_v32, 1.0  ;;  %vm321_vm8 = vcmp.ge.f32.partialorder %v2386_v32, 2.0 }
 0x107   :  { %v112_v43 = vmax.f32 %v103_v42, 0.0 }
 0x10b   :  { %2112 = vmatmul.msk.f32.gmra.mxu1 %vm126_vm2, %v109_v33 }
 0x10c   :  { %v105_v36 = vpop.f32.mrf.mxu3 }
 0x10d   :  { %v106_v45 = vadd.f32 %v2218_v26, %v105_v36 }
 0x10f   :  { %v113_v46 = vmax.f32 %v106_v45, 0.0 }
 0x113   :  { %2113 = vmatmul.msk.f32.gmra.mxu1 %vm126_vm2, %v110_v37 }
 0x114   :  { %v2319_v38 = vpop.f32.mrf.mxu3 }
 0x115   :  { %387 = vrot.lane.b32.xlu2 %v2319_v38, %s2269_s0  ;;  %338 = vrot.lane.b32.xlu0 %v2319_v38, %s2270_s28  ;;  %v305_v25 = vrot.slane %v2319_v38, 6 }
 0x11b   :  { %2114 = vmatmul.msk.f32.gmra.mxu1 %vm126_vm2, %v111_v40 }
 0x11c   :  { %v2326_v41 = vpop.f32.mrf.mxu3 }
 0x11d   :  { %340 = vrot.lane.b32.xlu0 %v2326_v41, %s2270_s28  ;;  %v306_v27 = vrot.slane %v2326_v41, 6 }
 0x11f   :  { %v318_v39 = vsel %vm313_vm3, %v305_v25, %v306_v27 }
 0x120   :  { %v327_v45 = vsel %vm321_vm8, %v318_v39, 0.0 }
 0x123   :  { %2115 = vmatmul.msk.f32.gmra.mxu1 %vm126_vm2, %v112_v43 }
 0x124   :  { %v2331_v44 = vpop.f32.mrf.mxu3 }
 0x125   :  { %391 = vrot.lane.b32.xlu0 %v2331_v44, %s2269_s0  ;;  %342 = vrot.lane.b32.xlu2 %v2331_v44, %s2270_s28  ;;  %v307_v51 = vrot.slane %v2331_v44, 6 }
 0x127   :  { %v317_v59 = vsel %vm313_vm3, %v306_v27, %v307_v51  ;;  %v2450_v27 = vld [vmem:[#allocation2 + $0x28] sm:$0xff] }
 0x128   :  { %vm374_vm15 = vcmp.ge.f32.partialorder %v2450_v27, 1.0  ;;  %vm325_vm0 = vcmp.ge.f32.partialorder %v2450_v27, 2.0 }
 0x12b   :  { %2116 = vmatmul.msk.f32.gmra.mxu1 %vm126_vm2, %v113_v46 }
 0x12c   :  { %v2338_v47 = vpop.f32.mrf.mxu3 }
 0x12d   :  { %393 = vrot.lane.b32.xlu2 %v2338_v47, %s2269_s0 }
 0x134   :  { %v2342_v48 = vpop.f32.mrf.mxu3 }
 0x135   :  { %346 = vrot.lane.b32.xlu0 %v2342_v48, %s2270_s28 }
 0x13c   :  { %v2348_v50 = vpop.f32.mrf.mxu3 }
 0x13d   :  { %425 = vrot.lane.b32.xlu0 %v2346_v49, %s2271_s29  ;;  %397 = vrot.lane.b32.xlu2 %v2348_v50, %s2269_s0  ;;  %v310_v22 = vrot.slane %v2348_v50, 6 }
 0x13e   :  { %348 = vrot.lane.b32.xlu1 %v2348_v50, %s2270_s28 }
 0x13f   :  { %v319_v30 = vsel %vm313_vm3, %v310_v22, %v305_v25 }
 0x140   :  { %v326_v35 = vsel %vm320_vm5, %v319_v30, 0.0 }
 0x146   :  { %389 = vrot.lane.b32.xlu1 %v2326_v41, %s2269_s0 }
 0x14e   :  { %344 = vrot.lane.b32.xlu1 %v2338_v47, %s2270_s28 }
 0x156   :  { %395 = vrot.lane.b32.xlu1 %v2342_v48, %s2269_s0 }
 0x16f   :  { %v388_v24 = vpop.permute.xlu2 %387 }
 0x17f   :  { %v343_v40 = vpop.permute.xlu2 %342 }
 0x180   :  { %v162_v62 = vpop.f32.mrf.mxu1  ;;  %v358_v52 = vrot.slane %v343_v40, 7 }
 0x181   :  { %v163_v63 = vadd.f32 %v2220_v61, %v162_v62  ;;  %v308_v62 = vrot.slane %v2338_v47, 6 }
 0x183   :  { %v180_v0 = vmax.f32 %v163_v63, 0.0 }
 0x185   :  { %2117 = vmatmul.msk.f32.vlgmr.msra.gmra.mxu2 %vm126_vm2, %v180_v0  ;;  %v2421_v0 = vld [vmem:[#allocation2 + $0x18] sm:$0xff] }
 0x186   :  { %vm372_vm11 = vcmp.ge.f32.partialorder %v2421_v0, 1.0  ;;  %vm323_vm12 = vcmp.ge.f32.partialorder %v2421_v0, 2.0 }
 0x187   :  { %v339_v14 = vpop.permute.xlu0 %338  ;;  %v394_v16 = vpop.permute.xlu2 %393 }
 0x188   :  { %v165_v1 = vpop.f32.mrf.mxu1  ;;  %v356_v29 = vrot.slane %v339_v14, 7  ;;  %v309_v14 = vrot.slane %v2342_v48, 6 }
 0x189   :  { %v166_v2 = vadd.f32 %v2220_v61, %v165_v1  ;;  %v328_v1 = vsel %vm322_vm10, %v317_v59, 0.0 }
 0x18b   :  { %v181_v3 = vmax.f32 %v166_v2, 0.0 }
 0x18d   :  { %2118 = vmatmul.msk.f32.gmra.mxu2 %vm126_vm2, %v181_v3 }
 0x18f   :  { %v341_v20 = vpop.permute.xlu0 %340 }
 0x190   :  { %v168_v4 = vpop.f32.mrf.mxu1  ;;  %v357_v26 = vrot.slane %v341_v20, 7 }
 0x191   :  { %v169_v5 = vadd.f32 %v2220_v61, %v168_v4 }
 0x192   :  { %v367_v34 = vsel %vm362_vm4, %v356_v29, %v357_v26  ;;  %v366_v56 = vsel %vm362_vm4, %v357_v26, %v358_v52 }
 0x193   :  { %v182_v6 = vmax.f32 %v169_v5, 0.0  ;;  %v376_v42 = vsel %vm370_vm7, %v367_v34, 0.0 }
 0x194   :  { %v382_v53 = vadd.f32 %v376_v42, %v327_v45 }
 0x195   :  { %2119 = vmatmul.msk.f32.gmra.mxu2 %vm126_vm2, %v182_v6  ;;  %v316_v6 = vsel %vm313_vm3, %v307_v51, %v308_v62  ;;  %v629_v51 = vld [vmem:[#allocation2 + $0x138] sm:$0xff] }
 0x196   :  { %v329_v11 = vsel %vm323_vm12, %v316_v6, 0.0  ;;  %662 = vmatpush.msra.mxu3 %v629_v51 }
 0x197   :  { %v392_v60 = vpop.permute.xlu0 %391  ;;  %v398_v42 = vpop.permute.xlu2 %397 }
 0x198   :  { %v171_v8 = vpop.f32.mrf.mxu1 }
 0x199   :  { %v172_v9 = vadd.f32 %v2220_v61, %v171_v8 }
 0x19b   :  { %v183_v10 = vmax.f32 %v172_v9, 0.0 }
 0x19d   :  { %2120 = vmatmul.msk.f32.gmra.mxu2 %vm126_vm2, %v183_v10 }
 0x1a0   :  { %v174_v12 = vpop.f32.mrf.mxu1 }
 0x1a1   :  { %v175_v13 = vadd.f32 %v2220_v61, %v174_v12 }
 0x1a3   :  { %v184_v15 = vmax.f32 %v175_v13, 0.0 }
 0x1a5   :  { %2121 = vmatmul.msk.f32.gmra.mxu2 %vm126_vm2, %v184_v15 }
 0x1a7   :  { %v347_v10 = vpop.permute.xlu0 %346 }
 0x1a8   :  { %v177_v17 = vpop.f32.mrf.mxu1  ;;  %v360_v15 = vrot.slane %v347_v10, 7 }
 0x1a9   :  { %v178_v18 = vadd.f32 %v2220_v61, %v177_v17  ;;  %v377_v61 = vsel %vm371_vm9, %v366_v56, 0.0  ;;  %v2438_v17 = vld [vmem:[#allocation2 + $0x20] sm:$0xff] }
 0x1aa   :  { %v383_v3 = vadd.f32 %v377_v61, %v328_v1  ;;  %vm373_vm13 = vcmp.ge.f32.partialorder %v2438_v17, 1.0  ;;  %vm324_vm14 = vcmp.ge.f32.partialorder %v2438_v17, 2.0 }
 0x1ab   :  { %v185_v19 = vmax.f32 %v178_v18, 0.0 }
 0x1ac   :  { %v407_v5 = vadd.f32 %v392_v60, %v383_v3 }
 0x1ad   :  { %2122 = vmatmul.msk.f32.gmra.mxu2 %vm126_vm2, %v185_v19  ;;  %vm746_vm2 = vcmp.lt.s32.totalorder %v2367_v21, 4 }
 0x1ae   :  { %v414_v12 = vadd.f32 %v2346_v49, %v407_v5 }
 0x1b0   :  { %v2378_v28 = vpop.permute.xlu1 %348  ;;  %v420_v19 = vmax.f32 %v414_v12, 0.0 }
 0x1b1   :  { %v361_v31 = vrot.slane %v2378_v28, 7 }
 0x1b3   :  { %v368_v33 = vsel %vm362_vm4, %v361_v31, %v356_v29 }
 0x1b4   :  { %v375_v36 = vsel %vm369_vm6, %v368_v33, 0.0  ;;  %v363_v33 = vsel %vm362_vm4, %v360_v15, %v361_v31 }
 0x1b5   :  { %v381_v37 = vadd.f32 %v375_v36, %v326_v35  ;;  %v314_v35 = vsel %vm313_vm3, %v309_v14, %v310_v22  ;;  %v380_v39 = vsel %vm374_vm15, %v363_v33, 0.0 }
 0x1b6   :  { %v331_v28 = vsel %vm325_vm0, %v314_v35, 0.0 }
 0x1b7   :  { %v405_v43 = vadd.f32 %v388_v24, %v381_v37  ;;  %v315_v24 = vsel %vm313_vm3, %v308_v62, %v309_v14  ;;  %v386_v40 = vadd.f32 %v380_v39, %v331_v28 }
 0x1b8   :  { %v390_v46 = vpop.permute.xlu1 %389  ;;  %v330_v29 = vsel %vm324_vm14, %v315_v24, 0.0 }
 0x1b9   :  { %v412_v54 = vadd.f32 %v2346_v49, %v405_v43  ;;  %v406_v57 = vadd.f32 %v390_v46, %v382_v53  ;;  %v410_v45 = vadd.f32 %v398_v42, %v386_v40  ;;  %v2221_v53 = vld [vmem:[#allocation2 + $0xe8] ss:$0 sm:$0xff] }
 0x1bb   :  { %v418_v58 = vmax.f32 %v412_v54, 0.0  ;;  %v413_v63 = vadd.f32 %v2346_v49, %v406_v57  ;;  %v417_v22 = vadd.f32 %v2346_v49, %v410_v45 }
 0x1bd   :  { %2129 = vmatmul.msk.f32.vlgmr.msrb.gmra.mxu0 %vm253_vm1, %v418_v58  ;;  %v419_v8 = vmax.f32 %v413_v63, 0.0  ;;  %v423_v46 = vmax.f32 %v417_v22, 0.0 }
 0x1c0   :  { %v345_v2 = vpop.permute.xlu1 %344 }
 0x1c1   :  { %v359_v4 = vrot.slane %v345_v2, 7 }
 0x1c3   :  { %v365_v7 = vsel %vm362_vm4, %v358_v52, %v359_v4  ;;  %v364_v18 = vsel %vm362_vm4, %v359_v4, %v360_v15  ;;  %v628_v52 = vld [vmem:[#allocation2 + $0x130] sm:$0xff] }
 0x1c4   :  { %v378_v9 = vsel %vm372_vm11, %v365_v7, 0.0  ;;  %v379_v25 = vsel %vm373_vm13, %v364_v18, 0.0  ;;  %663 = vmatpush.msra.mxu3 %v628_v52  ;;  %v426_v18 = vpop.permute.xlu0 %425 }
 0x1c5   :  { %2130 = vmatmul.msk.f32.gmra.mxu0 %vm253_vm1, %v419_v8  ;;  %v384_v13 = vadd.f32 %v378_v9, %v329_v11  ;;  %v385_v34 = vadd.f32 %v379_v25, %v330_v29  ;;  %v428_v25 = vadd.f32 %v426_v18, %v2319_v38  ;;  %v431_v29 = vadd.f32 %v426_v18, %v2338_v47  ;;  %v626_v38 = vld [vmem:[#allocation2 + $0x120] sm:$0xff] }
 0x1c7   :  { %v408_v20 = vadd.f32 %v394_v16, %v384_v13 }
 0x1c8   :  { %v396_v30 = vpop.permute.xlu1 %395 }
 0x1c9   :  { %v415_v26 = vadd.f32 %v2346_v49, %v408_v20  ;;  %v409_v36 = vadd.f32 %v396_v30, %v385_v34  ;;  %v432_v20 = vadd.f32 %v426_v18, %v2342_v48  ;;  %v430_v48 = vadd.f32 %v426_v18, %v2331_v44 }
 0x1cb   :  { %v421_v37 = vmax.f32 %v415_v26, 0.0  ;;  %v416_v31 = vadd.f32 %v2346_v49, %v409_v36  ;;  %v429_v26 = vadd.f32 %v426_v18, %v2326_v41 }
 0x1cd   :  { %2131 = vmatmul.msk.f32.gmra.mxu0 %vm253_vm1, %v420_v19  ;;  %v422_v43 = vmax.f32 %v416_v31, 0.0  ;;  %v433_v19 = vadd.f32 %v426_v18, %v2348_v50  ;;  %v627_v50 = vld [vmem:[#allocation2 + $0x128] sm:$0xff] }
 0x1ce   :  { %715 = vmatpush.msra.mxu1 %v627_v50 }
 0x1d0   :  { %716 = vmatpush.msra.mxu1 %v626_v38 }
 0x1d5   :  { %2132 = vmatmul.msk.f32.gmra.mxu0 %vm253_vm1, %v421_v37 }
 0x1dd   :  { %2133 = vmatmul.msk.f32.gmra.mxu0 %vm253_vm1, %v422_v43 }
 0x1e5   :  { %2134 = vmatmul.msk.f32.gmra.mxu0 %vm253_vm1, %v423_v46 }
 0x208   :  { %v233_v54 = vpop.f32.mrf.mxu2 }
 0x209   :  { %v2473_v56 = vadd.f32 %v2221_v53, %v233_v54 }
 0x20b   :  { %2135 = vmatmul.msk.f32.vlgmr.msra.gmra.mxu3 %vm253_vm1, %v2473_v56 }
 0x210   :  { %v236_v57 = vpop.f32.mrf.mxu2 }
 0x211   :  { %v2477_v58 = vadd.f32 %v2221_v53, %v236_v57  ;;  %v2222_v57 = vld [vmem:[#allocation2 + $0x118] ss:$0 sm:$0xff] }
 0x213   :  { %2136 = vmatmul.msk.f32.gmra.mxu3 %vm253_vm1, %v2477_v58 }
 0x218   :  { %v239_v49 = vpop.f32.mrf.mxu2 }
 0x219   :  { %v2481_v59 = vadd.f32 %v2221_v53, %v239_v49 }
 0x21b   :  { %2137 = vmatmul.msk.f32.gmra.mxu3 %vm253_vm1, %v2481_v59 }
 0x220   :  { %v242_v60 = vpop.f32.mrf.mxu2 }
 0x221   :  { %v2485_v61 = vadd.f32 %v2221_v53, %v242_v60 }
 0x223   :  { %2138 = vmatmul.msk.f32.gmra.mxu3 %vm253_vm1, %v2485_v61 }
 0x228   :  { %v245_v62 = vpop.f32.mrf.mxu2 }
 0x229   :  { %v2489_v63 = vadd.f32 %v2221_v53, %v245_v62 }
 0x22b   :  { %2139 = vmatmul.msk.f32.gmra.mxu3 %vm253_vm1, %v2489_v63 }
 0x230   :  { %v248_v1 = vpop.f32.mrf.mxu2 }
 0x231   :  { %v2493_v2 = vadd.f32 %v2221_v53, %v248_v1 }
 0x233   :  { %2140 = vmatmul.msk.f32.gmra.mxu3 %vm253_vm1, %v2493_v2 }
 0x23a   :  { %v469_v3 = vpop.f32.mrf.mxu0 }
 0x23b   :  { %553 = vrot.lane.b32.xlu0 %v469_v3, %s2269_s0  ;;  %511 = vrot.lane.b32.xlu1 %v469_v3, %s2270_s28  ;;  %v487_v5 = vrot.slane %v469_v3, 6 }
 0x242   :  { %v472_v4 = vpop.f32.mrf.mxu0 }
 0x243   :  { %v488_v6 = vrot.slane %v472_v4, 6  ;;  %555 = vrot.lane.b32.xlu0 %v472_v4, %s2269_s0  ;;  %513 = vrot.lane.b32.xlu1 %v472_v4, %s2270_s28 }
 0x245   :  { %v497_v7 = vsel %vm313_vm3, %v487_v5, %v488_v6 }
 0x246   :  { %v500_v46 = vsel %vm321_vm8, %v497_v7, 0.0 }
 0x24a   :  { %v475_v8 = vpop.f32.mrf.mxu0 }
 0x24b   :  { %v489_v9 = vrot.slane %v475_v8, 6  ;;  %557 = vrot.lane.b32.xlu0 %v475_v8, %s2269_s0  ;;  %515 = vrot.lane.b32.xlu1 %v475_v8, %s2270_s28 }
 0x24d   :  { %v2507_v10 = vsel %vm313_vm3, %v488_v6, %v489_v9 }
 0x24e   :  { %v501_v7 = vsel %vm322_vm10, %v2507_v10, 0.0 }
 0x252   :  { %v478_v11 = vpop.f32.mrf.mxu0 }
 0x253   :  { %v490_v12 = vrot.slane %v478_v11, 6  ;;  %559 = vrot.lane.b32.xlu0 %v478_v11, %s2269_s0  ;;  %517 = vrot.lane.b32.xlu1 %v478_v11, %s2270_s28 }
 0x255   :  { %v2513_v13 = vsel %vm313_vm3, %v489_v9, %v490_v12 }
 0x256   :  { %v502_v10 = vsel %vm323_vm12, %v2513_v13, 0.0 }
 0x25a   :  { %v2515_v14 = vpop.f32.mrf.mxu0 }
 0x25b   :  { %v491_v15 = vrot.slane %v2515_v14, 6  ;;  %561 = vrot.lane.b32.xlu0 %v2515_v14, %s2269_s0  ;;  %519 = vrot.lane.b32.xlu1 %v2515_v14, %s2270_s28 }
 0x25d   :  { %v2526_v16 = vsel %vm313_vm3, %v490_v12, %v491_v15 }
 0x262   :  { %v2530_v24 = vpop.f32.mrf.mxu0 }
 0x263   :  { %606 = vrot.lane.b32.xlu0 %v433_v19, %s2272_s30  ;;  %604 = vrot.lane.b32.xlu1 %v432_v20, %s2272_s30  ;;  %v492_v35 = vrot.slane %v2530_v24, 6 }
 0x264   :  { %521 = vrot.lane.b32.xlu2 %v2530_v24, %s2270_s28 }
 0x265   :  { %v498_v28 = vsel %vm313_vm3, %v492_v35, %v487_v5 }
 0x266   :  { %v499_v22 = vsel %vm320_vm5, %v498_v28, 0.0 }
 0x26c   :  { %596 = vrot.lane.b32.xlu2 %v428_v25, %s2272_s30 }
 0x274   :  { %598 = vrot.lane.b32.xlu2 %v429_v26, %s2272_s30 }
 0x27c   :  { %600 = vrot.lane.b32.xlu2 %v430_v48, %s2272_s30 }
 0x284   :  { %602 = vrot.lane.b32.xlu2 %v431_v29, %s2272_s30 }
 0x28c   :  { %563 = vrot.lane.b32.xlu2 %v2530_v24, %s2269_s0 }
 0x2ad   :  { %v512_v30 = vpop.permute.xlu1 %511  ;;  %v554_v33 = vpop.permute.xlu0 %553 }
 0x2ae   :  { %v529_v36 = vrot.slane %v512_v30, 7 }
 0x2b5   :  { %v514_v41 = vpop.permute.xlu1 %513  ;;  %v556_v39 = vpop.permute.xlu0 %555 }
 0x2b6   :  { %v530_v34 = vrot.slane %v514_v41, 7 }
 0x2b8   :  { %v539_v44 = vsel %vm362_vm4, %v529_v36, %v530_v34 }
 0x2b9   :  { %v542_v31 = vsel %vm370_vm7, %v539_v44, 0.0  ;;  %vm755_vm7 = vcmp.ge.f32.partialorder %v2408_v55, 4.0 }
 0x2ba   :  { %v548_v52 = vadd.f32 %v542_v31, %v500_v46 }
 0x2bc   :  { %v572_v1 = vadd.f32 %v556_v39, %v548_v52 }
 0x2bd   :  { %v516_v37 = vpop.permute.xlu1 %515  ;;  %v558_v3 = vpop.permute.xlu0 %557 }
 0x2be   :  { %v522_v47 = vpop.permute.xlu2 %521  ;;  %v531_v42 = vrot.slane %v516_v37, 7  ;;  %v579_v9 = vadd.f32 %v2222_v57, %v572_v1 }
 0x2bf   :  { %v534_v40 = vrot.slane %v522_v47, 7  ;;  %v503_v47 = vsel %vm324_vm14, %v2526_v16, 0.0  ;;  %v493_v16 = vsel %vm313_vm3, %v491_v15, %v492_v35 }
 0x2c0   :  { %v538_v53 = vsel %vm362_vm4, %v530_v34, %v531_v42  ;;  %v585_v26 = vmax.f32 %v579_v9, 0.0 }
 0x2c1   :  { %v540_v43 = vsel %vm362_vm4, %v534_v40, %v529_v36  ;;  %v543_v4 = vsel %vm371_vm9, %v538_v53, 0.0  ;;  %vm756_vm9 = vcmp.ge.f32.partialorder %v2421_v0, 4.0 }
 0x2c2   :  { %v541_v45 = vsel %vm369_vm6, %v540_v43, 0.0  ;;  %v549_v11 = vadd.f32 %v543_v4, %v501_v7  ;;  %vm754_vm6 = vcmp.ge.f32.partialorder %v2386_v32, 4.0 }
 0x2c3   :  { %v547_v51 = vadd.f32 %v541_v45, %v499_v22 }
 0x2c4   :  { %v573_v50 = vadd.f32 %v558_v3, %v549_v11 }
 0x2c5   :  { %v518_v54 = vpop.permute.xlu1 %517  ;;  %v571_v49 = vadd.f32 %v554_v33, %v547_v51  ;;  %v560_v38 = vpop.permute.xlu0 %559 }
 0x2c6   :  { %v597_v60 = vpop.permute.xlu2 %596  ;;  %v532_v5 = vrot.slane %v518_v54, 7  ;;  %v580_v33 = vadd.f32 %v2222_v57, %v573_v50 }
 0x2c7   :  { %v578_v62 = vadd.f32 %v2222_v57, %v571_v49  ;;  %v504_v49 = vsel %vm325_vm0, %v493_v16, 0.0 }
 0x2c8   :  { %v537_v12 = vsel %vm362_vm4, %v531_v42, %v532_v5  ;;  %v586_v37 = vmax.f32 %v580_v33, 0.0  ;;  %v2626_v33 = vld [vmem:[#allocation2 + $0x140] ss:$0 sm:$0xff] }
 0x2c9   :  { %v584_v6 = vmax.f32 %v578_v62, 0.0  ;;  %v544_v48 = vsel %vm372_vm11, %v537_v12, 0.0  ;;  %vm757_vm11 = vcmp.ge.f32.partialorder %v2438_v17, 4.0 }
 0x2ca   :  { %v550_v41 = vadd.f32 %v544_v48, %v502_v10 }
 0x2cb   :  { %v614_v8 = vadd.f32 %v597_v60, %v584_v6 }
 0x2cc   :  { %v574_v39 = vadd.f32 %v560_v38, %v550_v41 }
 0x2cd   :  { %v620_v18 = vmax.f32 %v614_v8, 0.0  ;;  %v520_v19 = vpop.permute.xlu1 %519  ;;  %v562_v42 = vpop.permute.xlu0 %561 }
 0x2ce   :  { %v599_v20 = vpop.permute.xlu2 %598  ;;  %v533_v25 = vrot.slane %v520_v19, 7  ;;  %v581_v31 = vadd.f32 %v2222_v57, %v574_v39  ;;  %v665_v8 = vpop.f32.mrf.mxu3 }
 0x2cf   :  { %2141 = vmatmul.msk.f32.vlgmr.msra.gmra.mxu1 %vm253_vm1, %v620_v18  ;;  %v615_v29 = vadd.f32 %v599_v20, %v585_v26 }
 0x2d0   :  { %v536_v30 = vsel %vm362_vm4, %v532_v5, %v533_v25  ;;  %v587_v46 = vmax.f32 %v581_v31, 0.0  ;;  %v535_v51 = vsel %vm362_vm4, %v533_v25, %v534_v40  ;;  %vm753_vm4 = vcmp.ge.f32.partialorder %v2371_v23, 4.0 }
 0x2d1   :  { %v621_v34 = vmax.f32 %v615_v29, 0.0  ;;  %v545_v36 = vsel %vm373_vm13, %v536_v30, 0.0  ;;  %v546_v54 = vsel %vm374_vm15, %v535_v51, 0.0  ;;  %v737_v30 = vld [vmem:[#allocation2 + $0x150] sm:$0xff]  ;;  %vm758_vm13 = vcmp.ge.f32.partialorder %v2450_v27, 4.0 }
 0x2d2   :  { %v551_v28 = vadd.f32 %v545_v36, %v503_v47  ;;  %v552_v1 = vadd.f32 %v546_v54, %v504_v49  ;;  %892 = vmatpush.msrb.mxu2 %v737_v30 }
 0x2d4   :  { %v575_v43 = vadd.f32 %v562_v42, %v551_v28 }
 0x2d5   :  { %v605_v4 = vpop.permute.xlu1 %604  ;;  %v607_v15 = vpop.permute.xlu0 %606 }
 0x2d6   :  { %v601_v44 = vpop.permute.xlu2 %600  ;;  %v582_v52 = vadd.f32 %v2222_v57, %v575_v43  ;;  %v668_v9 = vpop.f32.mrf.mxu3 }
 0x2d7   :  { %2142 = vmatmul.msk.f32.gmra.mxu1 %vm253_vm1, %v621_v34  ;;  %v616_v13 = vadd.f32 %v601_v44, %v586_v37  ;;  %v736_v44 = vld [vmem:[#allocation2 + $0x148] sm:$0xff] }
 0x2d8   :  { %v588_v60 = vmax.f32 %v582_v52, 0.0  ;;  %893 = vmatpush.msrb.mxu2 %v736_v44 }
 0x2d9   :  { %v622_v45 = vmax.f32 %v616_v13, 0.0 }
 0x2da   :  { %v618_v24 = vadd.f32 %v605_v4, %v588_v60 }
 0x2dc   :  { %v624_v14 = vmax.f32 %v618_v24, 0.0 }
 0x2de   :  { %v603_v22 = vpop.permute.xlu2 %602  ;;  %v671_v19 = vpop.f32.mrf.mxu3 }
 0x2df   :  { %2143 = vmatmul.msk.f32.gmra.mxu1 %vm253_vm1, %v622_v45  ;;  %v617_v53 = vadd.f32 %v603_v22, %v587_v46 }
 0x2e1   :  { %v623_v62 = vmax.f32 %v617_v53, 0.0 }
 0x2e6   :  { %v564_v3 = vpop.permute.xlu2 %563  ;;  %v674_v26 = vpop.f32.mrf.mxu3 }
 0x2e7   :  { %v576_v40 = vadd.f32 %v564_v3, %v552_v1  ;;  %2144 = vmatmul.msk.f32.gmra.mxu1 %vm253_vm1, %v623_v62 }
 0x2e9   :  { %v583_v5 = vadd.f32 %v2222_v57, %v576_v40 }
 0x2eb   :  { %v589_v6 = vmax.f32 %v583_v5, 0.0 }
 0x2ed   :  { %v619_v35 = vadd.f32 %v607_v15, %v589_v6 }
 0x2ee   :  { %v677_v29 = vpop.f32.mrf.mxu3 }
 0x2ef   :  { %2145 = vmatmul.msk.f32.gmra.mxu1 %vm253_vm1, %v624_v14  ;;  %v625_v7 = vmax.f32 %v619_v35, 0.0 }
 0x2f6   :  { %v680_v41 = vpop.f32.mrf.mxu3 }
 0x2f7   :  { %2146 = vmatmul.msk.f32.gmra.mxu1 %vm253_vm1, %v625_v7 }
 0x34c   :  { %v718_v11 = vpop.f32.mrf.mxu1 }
 0x34d   :  { %v2602_v12 = vadd.f32 %v718_v11, %v665_v8 }
 0x34f   :  { %813 = vrot.lane.b32.xlu0 %v2602_v12, %s2269_s0  ;;  %771 = vrot.lane.b32.xlu1 %v2602_v12, %s2270_s28  ;;  %v740_v13 = vrot.slane %v2602_v12, 4 }
 0x354   :  { %v721_v57 = vpop.f32.mrf.mxu1 }
 0x355   :  { %v2608_v18 = vadd.f32 %v721_v57, %v668_v9 }
 0x357   :  { %773 = vrot.lane.b32.xlu1 %v2608_v18, %s2270_s28  ;;  %v741_v42 = vrot.slane %v2608_v18, 4 }
 0x359   :  { %v751_v62 = vsel %vm746_vm2, %v740_v13, %v741_v42 }
 0x35a   :  { %v760_v4 = vsel %vm754_vm6, %v751_v62, 0.0 }
 0x35c   :  { %v724_v20 = vpop.f32.mrf.mxu1 }
 0x35d   :  { %v2612_v25 = vadd.f32 %v724_v20, %v671_v19 }
 0x35f   :  { %775 = vrot.lane.b32.xlu0 %v2612_v25, %s2270_s28  ;;  %817 = vrot.lane.b32.xlu1 %v2612_v25, %s2269_s0  ;;  %v742_v3 = vrot.slane %v2612_v25, 4 }
 0x361   :  { %v750_v15 = vsel %vm746_vm2, %v741_v42, %v742_v3 }
 0x362   :  { %v761_v11 = vsel %vm755_vm7, %v750_v15, 0.0 }
 0x364   :  { %v727_v50 = vpop.f32.mrf.mxu1 }
 0x365   :  { %v2618_v48 = vadd.f32 %v727_v50, %v674_v26 }
 0x367   :  { %819 = vrot.lane.b32.xlu0 %v2618_v48, %s2269_s0  ;;  %v743_v57 = vrot.slane %v2618_v48, 4 }
 0x369   :  { %v749_v30 = vsel %vm746_vm2, %v742_v3, %v743_v57 }
 0x36c   :  { %v730_v38 = vpop.f32.mrf.mxu1 }
 0x36d   :  { %v2622_v10 = vadd.f32 %v730_v38, %v677_v29 }
 0x36f   :  { %779 = vrot.lane.b32.xlu1 %v2622_v10, %s2270_s28 }
 0x374   :  { %v733_v34 = vpop.f32.mrf.mxu1 }
 0x375   :  { %v2628_v36 = vadd.f32 %v733_v34, %v680_v41 }
 0x377   :  { %851 = vrot.lane.b32.xlu1 %v2626_v33, %s2271_s29  ;;  %823 = vrot.lane.b32.xlu0 %v2628_v36, %s2269_s0  ;;  %v745_v28 = vrot.slane %v2628_v36, 4 }
 0x378   :  { %781 = vrot.lane.b32.xlu2 %v2628_v36, %s2270_s28 }
 0x379   :  { %v752_v22 = vsel %vm746_vm2, %v745_v28, %v740_v13 }
 0x37a   :  { %v759_v16 = vsel %vm753_vm4, %v752_v22, 0.0 }
 0x380   :  { %815 = vrot.lane.b32.xlu2 %v2608_v18, %s2269_s0 }
 0x388   :  { %777 = vrot.lane.b32.xlu2 %v2618_v48, %s2270_s28 }
 0x390   :  { %821 = vrot.lane.b32.xlu2 %v2622_v10, %s2269_s0 }
 0x3c1   :  { %v772_v37 = vpop.permute.xlu1 %771  ;;  %v814_v39 = vpop.permute.xlu0 %813 }
 0x3c2   :  { %v789_v45 = vrot.slane %v772_v37, 6  ;;  %v762_v37 = vsel %vm756_vm9, %v749_v30, 0.0 }
 0x3c9   :  { %v774_v47 = vpop.permute.xlu1 %773 }
 0x3ca   :  { %v790_v31 = vrot.slane %v774_v47, 6 }
 0x3cc   :  { %v799_v53 = vsel %vm313_vm3, %v789_v45, %v790_v31 }
 0x3cd   :  { %v802_v1 = vsel %vm321_vm8, %v799_v53, 0.0 }
 0x3ce   :  { %v808_v14 = vadd.f32 %v802_v1, %v760_v4 }
 0x3d1   :  { %v776_v51 = vpop.permute.xlu0 %775  ;;  %v818_v9 = vpop.permute.xlu1 %817 }
 0x3d2   :  { %v782_v43 = vpop.permute.xlu2 %781  ;;  %v791_v49 = vrot.slane %v776_v51, 6 }
 0x3d3   :  { %v794_v46 = vrot.slane %v782_v43, 6 }
 0x3d4   :  { %v798_v5 = vsel %vm313_vm3, %v790_v31, %v791_v49  ;;  %v744_v31 = vrot.slane %v2622_v10, 4 }
 0x3d5   :  { %v800_v52 = vsel %vm313_vm3, %v794_v46, %v789_v45  ;;  %v803_v8 = vsel %vm322_vm10, %v798_v5, 0.0 }
 0x3d6   :  { %v801_v54 = vsel %vm320_vm5, %v800_v52, 0.0  ;;  %v809_v19 = vadd.f32 %v803_v8, %v761_v11  ;;  %v748_v51 = vsel %vm746_vm2, %v743_v57, %v744_v31  ;;  %v747_v3 = vsel %vm746_vm2, %v744_v31, %v745_v28 }
 0x3d7   :  { %v807_v60 = vadd.f32 %v801_v54, %v759_v16  ;;  %v763_v16 = vsel %vm757_vm11, %v748_v51, 0.0 }
 0x3d8   :  { %v833_v29 = vadd.f32 %v818_v9, %v809_v19 }
 0x3d9   :  { %v831_v40 = vadd.f32 %v814_v39, %v807_v60  ;;  %v820_v42 = vpop.permute.xlu0 %819 }
 0x3da   :  { %v816_v24 = vpop.permute.xlu2 %815  ;;  %v840_v39 = vadd.f32 %v2626_v33, %v833_v29 }
 0x3db   :  { %v838_v6 = vadd.f32 %v2626_v33, %v831_v40  ;;  %v832_v35 = vadd.f32 %v816_v24, %v808_v14 }
 0x3dc   :  { %v846_v43 = vmax.f32 %v840_v39, 0.0 }
 0x3dd   :  { %v844_v7 = vmax.f32 %v838_v6, 0.0  ;;  %v839_v20 = vadd.f32 %v2626_v33, %v832_v35 }
 0x3df   :  { %2147 = vmatmul.msk.f32.vlgmr.msrb.gmra.mxu2 %vm253_vm1, %v844_v7  ;;  %v845_v38 = vmax.f32 %v839_v20, 0.0 }
 0x3e1   :  { %v780_v34 = vpop.permute.xlu1 %779 }
 0x3e2   :  { %v778_v26 = vpop.permute.xlu2 %777  ;;  %v793_v47 = vrot.slane %v780_v34, 6 }
 0x3e3   :  { %v792_v50 = vrot.slane %v778_v26, 6 }
 0x3e4   :  { %v795_v60 = vsel %vm313_vm3, %v793_v47, %v794_v46  ;;  %v764_v46 = vsel %vm758_vm13, %v747_v3, 0.0 }
 0x3e5   :  { %v797_v41 = vsel %vm313_vm3, %v791_v49, %v792_v50  ;;  %v796_v45 = vsel %vm313_vm3, %v792_v50, %v793_v47  ;;  %v806_v40 = vsel %vm325_vm0, %v795_v60, 0.0 }
 0x3e6   :  { %v804_v44 = vsel %vm323_vm12, %v797_v41, 0.0  ;;  %v805_v52 = vsel %vm324_vm14, %v796_v45, 0.0  ;;  %v812_v5 = vadd.f32 %v806_v40, %v764_v46 }
 0x3e7   :  { %2148 = vmatmul.msk.f32.gmra.mxu2 %vm253_vm1, %v845_v38  ;;  %v810_v13 = vadd.f32 %v804_v44, %v762_v37  ;;  %v811_v49 = vadd.f32 %v805_v52, %v763_v16 }
 0x3e9   :  { %v834_v22 = vadd.f32 %v820_v42, %v810_v13  ;;  %v824_v24 = vpop.permute.xlu0 %823  ;;  %v852_v20 = vpop.permute.xlu1 %851 }
 0x3ea   :  { %v822_v54 = vpop.permute.xlu2 %821  ;;  %v836_v14 = vadd.f32 %v824_v24, %v812_v5  ;;  %v856_v26 = vadd.f32 %v852_v20, %v2612_v25  ;;  %v857_v34 = vadd.f32 %v852_v20, %v2618_v48  ;;  %v858_v37 = vadd.f32 %v852_v20, %v2622_v10  ;;  %v1054_v10 = vld [vmem:[#allocation2 + $0x170] sm:$0xff] }
 0x3eb   :  { %v841_v53 = vadd.f32 %v2626_v33, %v834_v22  ;;  %v835_v62 = vadd.f32 %v822_v54, %v811_v49  ;;  %v854_v39 = vadd.f32 %v852_v20, %v2602_v12  ;;  %v859_v48 = vadd.f32 %v852_v20, %v2628_v36  ;;  %v1055_v12 = vld [vmem:[#allocation2 + $0x178] sm:$0xff]  ;;  %v1053_v36 = vld [vmem:[#allocation2 + $0x168] sm:$0xff] }
 0x3ec   :  { %v843_v15 = vadd.f32 %v2626_v33, %v836_v14  ;;  %v855_v47 = vadd.f32 %v852_v20, %v2608_v18  ;;  %1094 = vmatpush.msra.mxu0 %v1055_v12  ;;  %1147 = vmatpush.msrb.mxu3 %v1053_v36 }
 0x3ed   :  { %v847_v1 = vmax.f32 %v841_v53, 0.0  ;;  %v842_v4 = vadd.f32 %v2626_v33, %v835_v62 }
 0x3ee   :  { %v849_v35 = vmax.f32 %v843_v15, 0.0  ;;  %1095 = vmatpush.msra.mxu0 %v1054_v10 }
 0x3ef   :  { %2149 = vmatmul.msk.f32.gmra.mxu2 %vm253_vm1, %v846_v43  ;;  %v848_v6 = vmax.f32 %v842_v4, 0.0 }
 0x3f7   :  { %2150 = vmatmul.msk.f32.gmra.mxu2 %vm253_vm1, %v847_v1  ;;  %v1052_v1 = vld [vmem:[#allocation2 + $0x160] sm:$0xff] }
 0x3f8   :  { %1148 = vmatpush.msrb.mxu3 %v1052_v1 }
 0x3ff   :  { %2151 = vmatmul.msk.f32.gmra.mxu2 %vm253_vm1, %v848_v6 }
 0x407   :  { %2152 = vmatmul.msk.f32.gmra.mxu2 %vm253_vm1, %v849_v35 }
 0x462   :  { %v2719_v28 = vpop.f32.mrf.mxu2 }
 0x463   :  { %979 = vrot.lane.b32.xlu1 %v2719_v28, %s2269_s0  ;;  %937 = vrot.lane.b32.xlu2 %v2719_v28, %s2270_s28  ;;  %v913_v8 = vrot.slane %v2719_v28, 4 }
 0x46a   :  { %v898_v7 = vpop.f32.mrf.mxu2 }
 0x46b   :  { %v914_v9 = vrot.slane %v898_v7, 4  ;;  %981 = vrot.lane.b32.xlu1 %v898_v7, %s2269_s0  ;;  %939 = vrot.lane.b32.xlu2 %v898_v7, %s2270_s28  ;;  %v2809_v7 = vld [vmem:[#allocation2 + $0x158] ss:$0 sm:$0xff] }
 0x46d   :  { %v923_v33 = vsel %vm746_vm2, %v913_v8, %v914_v9 }
 0x46e   :  { %v926_v45 = vsel %vm754_vm6, %v923_v33, 0.0 }
 0x472   :  { %v901_v11 = vpop.f32.mrf.mxu2 }
 0x473   :  { %v915_v57 = vrot.slane %v901_v11, 4  ;;  %983 = vrot.lane.b32.xlu1 %v901_v11, %s2269_s0  ;;  %941 = vrot.lane.b32.xlu2 %v901_v11, %s2270_s28 }
 0x475   :  { %v922_v19 = vsel %vm746_vm2, %v914_v9, %v915_v57 }
 0x476   :  { %v927_v54 = vsel %vm755_vm7, %v922_v19, 0.0 }
 0x47a   :  { %v904_v50 = vpop.f32.mrf.mxu2 }
 0x47b   :  { %v916_v29 = vrot.slane %v904_v50, 4  ;;  %1026 = vrot.lane.b32.xlu1 %v856_v26, %s2272_s30  ;;  %1056 = vrot.lane.b32.xlu2 %v2473_v56, %s2270_s28 }
 0x47d   :  { %v2742_v38 = vsel %vm746_vm2, %v915_v57, %v916_v29 }
 0x482   :  { %v2744_v30 = vpop.f32.mrf.mxu2 }
 0x483   :  { %v917_v41 = vrot.slane %v2744_v30, 4  ;;  %985 = vrot.lane.b32.xlu2 %v904_v50, %s2269_s0  ;;  %945 = vrot.lane.b32.xlu1 %v2744_v30, %s2270_s28 }
 0x485   :  { %v2754_v25 = vsel %vm746_vm2, %v916_v29, %v917_v41 }
 0x48a   :  { %v2757_v44 = vpop.f32.mrf.mxu2 }
 0x48b   :  { %1028 = vrot.lane.b32.xlu2 %v857_v34, %s2272_s30  ;;  %1060 = vrot.lane.b32.xlu1 %v2481_v59, %s2270_s28  ;;  %v918_v40 = vrot.slane %v2757_v44, 4 }
 0x48c   :  { %947 = vrot.lane.b32.xlu0 %v2757_v44, %s2270_s28 }
 0x48d   :  { %v924_v46 = vsel %vm746_vm2, %v918_v40, %v913_v8 }
 0x48e   :  { %v925_v15 = vsel %vm753_vm4, %v924_v46, 0.0 }
 0x493   :  { %1030 = vrot.lane.b32.xlu2 %v858_v37, %s2272_s30  ;;  %1062 = vrot.lane.b32.xlu1 %v2485_v61, %s2270_s28 }
 0x494   :  { %1022 = vrot.lane.b32.xlu0 %v854_v39, %s2272_s30 }
 0x49b   :  { %1032 = vrot.lane.b32.xlu2 %v859_v48, %s2272_s30  ;;  %1066 = vrot.lane.b32.xlu1 %v2493_v2, %s2270_s28 }
 0x49c   :  { %1024 = vrot.lane.b32.xlu0 %v855_v47, %s2272_s30 }
 0x4a4   :  { %943 = vrot.lane.b32.xlu0 %v904_v50, %s2270_s28 }
 0x4ac   :  { %1058 = vrot.lane.b32.xlu0 %v2477_v58, %s2270_s28 }
 0x4b4   :  { %987 = vrot.lane.b32.xlu0 %v2744_v30, %s2269_s0 }
 0x4bc   :  { %989 = vrot.lane.b32.xlu0 %v2757_v44, %s2269_s0 }
 0x4bd   :  { %v938_v18 = vpop.permute.xlu2 %937 }
 0x4be   :  { %v955_v31 = vrot.slane %v938_v18, 6 }
 0x4c4   :  { %1064 = vrot.lane.b32.xlu0 %v2489_v63, %s2270_s28 }
 0x4c5   :  { %v940_v13 = vpop.permute.xlu2 %939 }
 0x4c6   :  { %v956_v42 = vrot.slane %v940_v13, 6 }
 0x4c8   :  { %v965_v43 = vsel %vm313_vm3, %v955_v31, %v956_v42 }
 0x4c9   :  { %v968_v22 = vsel %vm321_vm8, %v965_v43, 0.0 }
 0x4ca   :  { %v974_v51 = vadd.f32 %v968_v22, %v926_v45 }
 0x4cd   :  { %v942_v52 = vpop.permute.xlu2 %941 }
 0x4ce   :  { %v957_v53 = vrot.slane %v942_v52, 6 }
 0x4d0   :  { %v964_v16 = vsel %vm313_vm3, %v956_v42, %v957_v53  ;;  %v928_v42 = vsel %vm756_vm9, %v2742_v38, 0.0 }
 0x4d1   :  { %v969_v49 = vsel %vm322_vm10, %v964_v16, 0.0 }
 0x4d2   :  { %v975_v60 = vadd.f32 %v969_v49, %v927_v54 }
 0x4d5   :  { %v1057_v62 = vpop.permute.xlu2 %1056  ;;  %v980_v3 = vpop.permute.xlu1 %979 }
 0x4d6   :  { %2153 = vmatmul.msk.f32.vlgmr.msra.gmra.mxu0 %vm253_vm1, %v1057_v62 }
 0x4dd   :  { %v982_v4 = vpop.permute.xlu1 %981  ;;  %v986_v47 = vpop.permute.xlu2 %985 }
 0x4de   :  { %v998_v28 = vadd.f32 %v982_v4, %v974_v51 }
 0x4e0   :  { %v1005_v19 = vadd.f32 %v2809_v7, %v998_v28 }
 0x4e2   :  { %v1011_v34 = vmax.f32 %v1005_v19, 0.0 }
 0x4e5   :  { %v984_v33 = vpop.permute.xlu1 %983  ;;  %v1029_v49 = vpop.permute.xlu2 %1028 }
 0x4e6   :  { %v999_v29 = vadd.f32 %v984_v33, %v975_v60 }
 0x4e8   :  { %v1006_v39 = vadd.f32 %v2809_v7, %v999_v29 }
 0x4ea   :  { %v1012_v10 = vmax.f32 %v1006_v39, 0.0 }
 0x4ed   :  { %v1027_v44 = vpop.permute.xlu1 %1026 }
 0x4ee   :  { %v1042_v36 = vadd.f32 %v1027_v44, %v1012_v10 }
 0x4f0   :  { %v1048_v22 = vmax.f32 %v1042_v36, 0.0 }
 0x4fe   :  { %v948_v24 = vpop.permute.xlu0 %947 }
 0x4ff   :  { %v960_v5 = vrot.slane %v948_v24, 6 }
 0x501   :  { %v966_v14 = vsel %vm313_vm3, %v960_v5, %v955_v31  ;;  %v946_v31 = vpop.permute.xlu1 %945 }
 0x502   :  { %v967_v6 = vsel %vm320_vm5, %v966_v14, 0.0  ;;  %v959_v51 = vrot.slane %v946_v31, 6 }
 0x503   :  { %v973_v35 = vadd.f32 %v967_v6, %v925_v15 }
 0x504   :  { %v961_v6 = vsel %vm313_vm3, %v959_v51, %v960_v5 }
 0x505   :  { %v997_v9 = vadd.f32 %v980_v3, %v973_v35  ;;  %v929_v3 = vsel %vm757_vm11, %v2754_v25, 0.0  ;;  %v919_v35 = vsel %vm746_vm2, %v917_v41, %v918_v40  ;;  %v972_v25 = vsel %vm325_vm0, %v961_v6, 0.0 }
 0x506   :  { %v1023_v11 = vpop.permute.xlu0 %1022 }
 0x507   :  { %v1004_v57 = vadd.f32 %v2809_v7, %v997_v9  ;;  %v1031_v9 = vpop.permute.xlu2 %1030 }
 0x509   :  { %v1010_v8 = vmax.f32 %v1004_v57, 0.0  ;;  %v1061_v1 = vpop.permute.xlu1 %1060 }
 0x50b   :  { %v1040_v20 = vadd.f32 %v1023_v11, %v1010_v8  ;;  %v930_v11 = vsel %vm758_vm13, %v919_v35, 0.0 }
 0x50c   :  { %v978_v28 = vadd.f32 %v972_v25, %v930_v11 }
 0x50d   :  { %v1046_v26 = vmax.f32 %v1040_v20, 0.0 }
 0x50e   :  { %v1025_v50 = vpop.permute.xlu0 %1024 }
 0x50f   :  { %2159 = vmatmul.msk.f32.vlgmr.msrb.gmra.mxu3 %vm253_vm1, %v1046_v26  ;;  %v1041_v37 = vadd.f32 %v1025_v50, %v1011_v34  ;;  %v1033_v40 = vpop.permute.xlu2 %1032 }
 0x511   :  { %v1047_v48 = vmax.f32 %v1041_v37, 0.0  ;;  %v1063_v8 = vpop.permute.xlu1 %1062 }
 0x516   :  { %v944_v12 = vpop.permute.xlu0 %943 }
 0x517   :  { %v958_v18 = vrot.slane %v944_v12, 6  ;;  %2160 = vmatmul.msk.f32.gmra.mxu3 %vm253_vm1, %v1047_v48 }
 0x519   :  { %v963_v13 = vsel %vm313_vm3, %v957_v53, %v958_v18  ;;  %v962_v53 = vsel %vm313_vm3, %v958_v18, %v959_v51  ;;  %v1067_v34 = vpop.permute.xlu1 %1066 }
 0x51a   :  { %v970_v43 = vsel %vm323_vm12, %v963_v13, 0.0  ;;  %v971_v38 = vsel %vm324_vm14, %v962_v53, 0.0  ;;  %v1169_v53 = vld [vmem:[#allocation2 + $0x190] sm:$0xff] }
 0x51b   :  { %v976_v45 = vadd.f32 %v970_v43, %v928_v42  ;;  %v977_v4 = vadd.f32 %v971_v38, %v929_v3  ;;  %1311 = vmatpush.msrb.mxu1 %v1169_v53 }
 0x51d   :  { %v1000_v52 = vadd.f32 %v986_v47, %v976_v45 }
 0x51e   :  { %v1059_v16 = vpop.permute.xlu0 %1058 }
 0x51f   :  { %2154 = vmatmul.msk.f32.gmra.mxu0 %vm253_vm1, %v1059_v16  ;;  %2161 = vmatmul.msk.f32.gmra.mxu3 %vm253_vm1, %v1048_v22  ;;  %v1007_v54 = vadd.f32 %v2809_v7, %v1000_v52  ;;  %v2876_v22 = vld [vmem:[#allocation2 + $0x180] ss:$0 sm:$0xff] }
 0x521   :  { %v1013_v60 = vmax.f32 %v1007_v54, 0.0  ;;  %v1168_v54 = vld [vmem:[#allocation2 + $0x188] sm:$0xff] }
 0x522   :  { %1312 = vmatpush.msrb.mxu1 %v1168_v54 }
 0x523   :  { %v1043_v62 = vadd.f32 %v1029_v49, %v1013_v60 }
 0x525   :  { %v1049_v24 = vmax.f32 %v1043_v62, 0.0 }
 0x526   :  { %v988_v46 = vpop.permute.xlu0 %987 }
 0x527   :  { %v1001_v14 = vadd.f32 %v988_v46, %v977_v4  ;;  %2155 = vmatmul.msk.f32.gmra.mxu0 %vm253_vm1, %v1061_v1  ;;  %2162 = vmatmul.msk.f32.gmra.mxu3 %vm253_vm1, %v1049_v24  ;;  %v2892_v4 = vld [vmem:[#allocation2] sm:$0xff] }
 0x528   :  { %vm1172_vm3 = vcmp.ge.f32.partialorder %v2892_v4, 8.0  ;;  %vm1579_vm15 = vcmp.ge.f32.partialorder %v2892_v4, 16.0 }
 0x529   :  { %v1008_v15 = vadd.f32 %v2809_v7, %v1001_v14 }
 0x52b   :  { %v1014_v33 = vmax.f32 %v1008_v15, 0.0 }
 0x52d   :  { %v1044_v57 = vadd.f32 %v1031_v9, %v1014_v33  ;;  %v2904_v33 = vld [vmem:[#allocation2 + $0x8] sm:$0xff] }
 0x52e   :  { %v990_v19 = vpop.permute.xlu0 %989  ;;  %vm1173_vm5 = vcmp.ge.f32.partialorder %v2904_v33, 8.0  ;;  %vm1580_vm0 = vcmp.ge.f32.partialorder %v2904_v33, 16.0 }
 0x52f   :  { %v1002_v5 = vadd.f32 %v990_v19, %v978_v28  ;;  %2156 = vmatmul.msk.f32.gmra.mxu0 %vm253_vm1, %v1063_v8  ;;  %v1050_v20 = vmax.f32 %v1044_v57, 0.0 }
 0x531   :  { %v1009_v30 = vadd.f32 %v2809_v7, %v1002_v5  ;;  %2163 = vmatmul.msk.f32.gmra.mxu3 %vm253_vm1, %v1050_v20 }
 0x533   :  { %v1015_v41 = vmax.f32 %v1009_v30, 0.0  ;;  %v2915_v30 = vld [vmem:[#allocation2 + $0x10] sm:$0xff] }
 0x534   :  { %vm1174_vm8 = vcmp.ge.f32.partialorder %v2915_v30, 8.0 }
 0x535   :  { %v1045_v26 = vadd.f32 %v1033_v40, %v1015_v41 }
 0x536   :  { %v1065_v50 = vpop.permute.xlu0 %1064 }
 0x537   :  { %2157 = vmatmul.msk.f32.gmra.mxu0 %vm253_vm1, %v1065_v50  ;;  %v1051_v29 = vmax.f32 %v1045_v26, 0.0 }
 0x539   :  { %2164 = vmatmul.msk.f32.gmra.mxu3 %vm253_vm1, %v1051_v29 }
 0x53f   :  { %2158 = vmatmul.msk.f32.gmra.mxu0 %vm253_vm1, %v1067_v34 }
 0x553   :  { %v1097_v44 = vpop.f32.mrf.mxu0 }
 0x592   :  { %v1150_v37 = vpop.f32.mrf.mxu3 }
 0x593   :  { %v2852_v39 = vadd.f32 %v1150_v37, %v1097_v44 }
 0x595   :  { %1232 = vrot.lane.b32.xlu1 %v2852_v39, %s2269_s0  ;;  %1190 = vrot.lane.b32.xlu2 %v2852_v39, %s2270_s28  ;;  %v1179_v57 = vsel %vm1173_vm5, %v2852_v39, 0.0 }
 0x59a   :  { %v1153_v7 = vpop.f32.mrf.mxu3 }
 0x59c   :  { %v1100_v48 = vpop.f32.mrf.mxu0 }
 0x59d   :  { %v2858_v47 = vadd.f32 %v1153_v7, %v1100_v48 }
 0x59f   :  { %1192 = vrot.lane.b32.xlu2 %v2858_v47, %s2270_s28  ;;  %v1180_v29 = vsel %vm1174_vm8, %v2858_v47, 0.0 }
 0x5a2   :  { %v1156_v12 = vpop.f32.mrf.mxu3 }
 0x5a4   :  { %v1103_v10 = vpop.f32.mrf.mxu0 }
 0x5a5   :  { %v2862_v18 = vadd.f32 %v1156_v12, %v1103_v10  ;;  %v2925_v12 = vld [vmem:[#allocation2 + $0x18] sm:$0xff] }
 0x5a6   :  { %vm1175_vm10 = vcmp.ge.f32.partialorder %v2925_v12, 8.0 }
 0x5a7   :  { %1194 = vrot.lane.b32.xlu1 %v2862_v18, %s2270_s28  ;;  %1236 = vrot.lane.b32.xlu2 %v2862_v18, %s2269_s0 }
 0x5aa   :  { %v1159_v36 = vpop.f32.mrf.mxu3 }
 0x5ac   :  { %v1106_v13 = vpop.f32.mrf.mxu0 }
 0x5ad   :  { %v2868_v31 = vadd.f32 %v1159_v36, %v1106_v13 }
 0x5af   :  { %1238 = vrot.lane.b32.xlu1 %v2868_v31, %s2269_s0 }
 0x5b4   :  { %v1109_v42 = vpop.f32.mrf.mxu0  ;;  %v1162_v43 = vpop.f32.mrf.mxu3 }
 0x5b5   :  { %v2872_v45 = vadd.f32 %v1162_v43, %v1109_v42  ;;  %v1181_v43 = vsel %vm1175_vm10, %v2862_v18, 0.0 }
 0x5b7   :  { %1198 = vrot.lane.b32.xlu2 %v2872_v45, %s2270_s28 }
 0x5bc   :  { %v1112_v51 = vpop.f32.mrf.mxu0  ;;  %v1165_v52 = vpop.f32.mrf.mxu3 }
 0x5bd   :  { %v2878_v16 = vadd.f32 %v1165_v52, %v1112_v51 }
 0x5bf   :  { %1270 = vrot.lane.b32.xlu2 %v2876_v22, %s2271_s29  ;;  %1242 = vrot.lane.b32.xlu1 %v2878_v16, %s2269_s0  ;;  %v1178_v15 = vsel %vm1172_vm3, %v2878_v16, 0.0 }
 0x5c0   :  { %1200 = vrot.lane.b32.xlu0 %v2878_v16, %s2270_s28 }
 0x5c8   :  { %1234 = vrot.lane.b32.xlu0 %v2858_v47, %s2269_s0 }
 0x5d0   :  { %1196 = vrot.lane.b32.xlu0 %v2868_v31, %s2270_s28 }
 0x5d8   :  { %1240 = vrot.lane.b32.xlu0 %v2872_v45, %s2269_s0 }
 0x5ef   :  { %v1191_v49 = vpop.permute.xlu2 %1190 }
 0x5f0   :  { %v1208_v3 = vrot.slane %v1191_v49, 4 }
 0x5f9   :  { %v1193_v38 = vpop.permute.xlu2 %1192 }
 0x5fa   :  { %v1209_v62 = vrot.slane %v1193_v38, 4 }
 0x5fc   :  { %v1218_v6 = vsel %vm746_vm2, %v1208_v3, %v1209_v62 }
 0x5fd   :  { %v1221_v11 = vsel %vm754_vm6, %v1218_v6, 0.0 }
 0x5fe   :  { %v1227_v20 = vadd.f32 %v1221_v11, %v1179_v57 }
 0x601   :  { %v1237_v50 = vpop.permute.xlu2 %1236 }
 0x607   :  { %v1233_v60 = vpop.permute.xlu1 %1232 }
 0x611   :  { %v1199_v42 = vpop.permute.xlu2 %1198 }
 0x612   :  { %v1212_v53 = vrot.slane %v1199_v42, 4 }
 0x619   :  { %v1195_v46 = vpop.permute.xlu1 %1194 }
 0x61a   :  { %v1210_v9 = vrot.slane %v1195_v46, 4 }
 0x61c   :  { %v1217_v19 = vsel %vm746_vm2, %v1209_v62, %v1210_v9  ;;  %v2939_v62 = vld [vmem:[#allocation2 + $0x20] sm:$0xff] }
 0x61d   :  { %v1222_v26 = vsel %vm755_vm7, %v1217_v19, 0.0  ;;  %vm1176_vm12 = vcmp.ge.f32.partialorder %v2939_v62, 8.0 }
 0x61e   :  { %v1228_v34 = vadd.f32 %v1222_v26, %v1180_v29  ;;  %v1182_v46 = vsel %vm1176_vm12, %v2868_v31, 0.0  ;;  %v1271_v26 = vpop.permute.xlu2 %1270 }
 0x620   :  { %v1252_v36 = vadd.f32 %v1237_v50, %v1228_v34  ;;  %v1273_v50 = vadd.f32 %v1271_v26, %v2852_v39 }
 0x621   :  { %v1239_v54 = vpop.permute.xlu1 %1238 }
 0x622   :  { %v1259_v52 = vadd.f32 %v2876_v22, %v1252_v36  ;;  %v1459_v36 = vld [vmem:[#allocation2 + $0x1a0] sm:$0xff] }
 0x632   :  { %v1201_v1 = vpop.permute.xlu0 %1200 }
 0x633   :  { %v1213_v24 = vrot.slane %v1201_v1, 4 }
 0x635   :  { %v1219_v14 = vsel %vm746_vm2, %v1213_v24, %v1208_v3  ;;  %v1214_v6 = vsel %vm746_vm2, %v1212_v53, %v1213_v24  ;;  %v1243_v24 = vpop.permute.xlu1 %1242 }
 0x636   :  { %v1220_v35 = vsel %vm753_vm4, %v1219_v14, 0.0  ;;  %v1225_v11 = vsel %vm758_vm13, %v1214_v6, 0.0 }
 0x637   :  { %v1226_v25 = vadd.f32 %v1220_v35, %v1178_v15  ;;  %v2951_v35 = vld [vmem:[#allocation2 + $0x28] sm:$0xff] }
 0x638   :  { %vm1177_vm14 = vcmp.ge.f32.partialorder %v2951_v35, 8.0 }
 0x639   :  { %v1250_v28 = vadd.f32 %v1233_v60, %v1226_v25  ;;  %v1265_v60 = vmax.f32 %v1259_v52, 0.0 }
 0x63a   :  { %v1235_v8 = vpop.permute.xlu0 %1234 }
 0x63b   :  { %v1257_v5 = vadd.f32 %v2876_v22, %v1250_v28  ;;  %v1251_v40 = vadd.f32 %v1235_v8, %v1227_v20  ;;  %v1183_v28 = vsel %vm1177_vm14, %v2872_v45, 0.0 }
 0x63c   :  { %v1231_v57 = vadd.f32 %v1225_v11, %v1183_v28  ;;  %v3028_v11 = vld [vmem:[#allocation2 + $0x198] ss:$0 sm:$0xff] }
 0x63d   :  { %v1263_v41 = vmax.f32 %v1257_v5, 0.0  ;;  %v1258_v44 = vadd.f32 %v2876_v22, %v1251_v40 }
 0x63e   :  { %v1255_v5 = vadd.f32 %v1243_v24, %v1231_v57 }
 0x63f   :  { %2165 = vmatmul.msk.f32.vlgmr.msrb.gmra.mxu1 %vm253_vm1, %v1263_v41  ;;  %v1264_v48 = vmax.f32 %v1258_v44, 0.0 }
 0x640   :  { %v1262_v20 = vadd.f32 %v2876_v22, %v1255_v5 }
 0x642   :  { %v1197_v37 = vpop.permute.xlu0 %1196  ;;  %v1268_v41 = vmax.f32 %v1262_v20, 0.0 }
 0x643   :  { %v1211_v7 = vrot.slane %v1197_v37, 4  ;;  %v1276_v37 = vadd.f32 %v1271_v26, %v2868_v31  ;;  %v1278_v31 = vadd.f32 %v1271_v26, %v2878_v16  ;;  %v1462_v16 = vld [vmem:[#allocation2 + $0x1b8] sm:$0xff] }
 0x644   :  { %1501 = vmatpush.msra.mxu2 %v1462_v16 }
 0x645   :  { %v1216_v10 = vsel %vm746_vm2, %v1210_v9, %v1211_v7  ;;  %v1215_v49 = vsel %vm746_vm2, %v1211_v7, %v1212_v53 }
 0x646   :  { %v1223_v13 = vsel %vm756_vm9, %v1216_v10, 0.0  ;;  %v1224_v1 = vsel %vm757_vm11, %v1215_v49, 0.0  ;;  %v1461_v10 = vld [vmem:[#allocation2 + $0x1b0] sm:$0xff] }
 0x647   :  { %2166 = vmatmul.msk.f32.gmra.mxu1 %vm253_vm1, %v1264_v48  ;;  %v1229_v51 = vadd.f32 %v1223_v13, %v1181_v43  ;;  %v1230_v15 = vadd.f32 %v1224_v1, %v1182_v46  ;;  %v1460_v48 = vld [vmem:[#allocation2 + $0x1a8] sm:$0xff]  ;;  %1502 = vmatpush.msra.mxu2 %v1461_v10 }
 0x648   :  { %1554 = vmatpush.msrb.mxu0 %v1460_v48 }
 0x649   :  { %v1253_v38 = vadd.f32 %v1239_v54, %v1229_v51 }
 0x64a   :  { %v1241_v14 = vpop.permute.xlu0 %1240  ;;  %1555 = vmatpush.msrb.mxu0 %v1459_v36 }
 0x64b   :  { %v1260_v3 = vadd.f32 %v2876_v22, %v1253_v38  ;;  %v1254_v9 = vadd.f32 %v1241_v14, %v1230_v15 }
 0x64d   :  { %v1266_v25 = vmax.f32 %v1260_v3, 0.0  ;;  %v1261_v8 = vadd.f32 %v2876_v22, %v1254_v9  ;;  %v1274_v22 = vadd.f32 %v1271_v26, %v2858_v47  ;;  %v1277_v47 = vadd.f32 %v1271_v26, %v2872_v45 }
 0x64e   :  { %v1275_v45 = vadd.f32 %v1271_v26, %v2862_v18 }
 0x64f   :  { %2167 = vmatmul.msk.f32.gmra.mxu1 %vm253_vm1, %v1265_v60  ;;  %v1267_v19 = vmax.f32 %v1261_v8, 0.0 }
 0x657   :  { %2168 = vmatmul.msk.f32.gmra.mxu1 %vm253_vm1, %v1266_v25 }
 0x65f   :  { %2169 = vmatmul.msk.f32.gmra.mxu1 %vm253_vm1, %v1267_v19 }
 0x667   :  { %2170 = vmatmul.msk.f32.gmra.mxu1 %vm253_vm1, %v1268_v41 }
 0x6bc   :  { %v1314_v40 = vpop.f32.mrf.mxu1 }
 0x6bd   :  { %1386 = vrot.lane.b32.xlu2 %v1314_v40, %s2269_s0  ;;  %1344 = vrot.lane.b32.xlu0 %v1314_v40, %s2270_s28  ;;  %v1333_v9 = vsel %vm1173_vm5, %v1314_v40, 0.0 }
 0x6c4   :  { %v2967_v29 = vpop.f32.mrf.mxu1 }
 0x6c5   :  { %1429 = vrot.lane.b32.xlu2 %v1273_v50, %s2272_s30  ;;  %1346 = vrot.lane.b32.xlu0 %v2967_v29, %s2270_s28  ;;  %v1334_v10 = vsel %vm1174_vm8, %v2967_v29, 0.0 }
 0x6cc   :  { %v2972_v34 = vpop.f32.mrf.mxu1 }
 0x6cd   :  { %1465 = vrot.lane.b32.xlu2 %v2477_v58, %s2269_s0  ;;  %1388 = vrot.lane.b32.xlu0 %v2967_v29, %s2269_s0  ;;  %v1335_v48 = vsel %vm1175_vm10, %v2972_v34, 0.0 }
 0x6d4   :  { %v2979_v44 = vpop.f32.mrf.mxu1 }
 0x6d5   :  { %1431 = vrot.lane.b32.xlu0 %v1274_v22, %s2272_s30  ;;  %1350 = vrot.lane.b32.xlu2 %v2979_v44, %s2270_s28 }
 0x6dc   :  { %v2984_v39 = vpop.f32.mrf.mxu1 }
 0x6dd   :  { %1467 = vrot.lane.b32.xlu0 %v2481_v59, %s2269_s0  ;;  %1392 = vrot.lane.b32.xlu2 %v2979_v44, %s2269_s0 }
 0x6e4   :  { %v1329_v7 = vpop.f32.mrf.mxu1 }
 0x6e5   :  { %1435 = vrot.lane.b32.xlu2 %v1276_v37, %s2272_s30  ;;  %1352 = vrot.lane.b32.xlu0 %v2984_v39, %s2270_s28  ;;  %v1332_v3 = vsel %vm1172_vm3, %v1329_v7, 0.0 }
 0x6e6   :  { %1354 = vrot.lane.b32.xlu1 %v1329_v7, %s2270_s28 }
 0x6ed   :  { %1437 = vrot.lane.b32.xlu2 %v1277_v47, %s2272_s30  ;;  %1394 = vrot.lane.b32.xlu0 %v2984_v39, %s2269_s0 }
 0x6ee   :  { %1463 = vrot.lane.b32.xlu1 %v2473_v56, %s2269_s0 }
 0x6f5   :  { %1439 = vrot.lane.b32.xlu2 %v1278_v31, %s2272_s30  ;;  %1396 = vrot.lane.b32.xlu0 %v1329_v7, %s2269_s0 }
 0x6f6   :  { %1348 = vrot.lane.b32.xlu1 %v2972_v34, %s2270_s28 }
 0x6fe   :  { %1390 = vrot.lane.b32.xlu1 %v2972_v34, %s2269_s0 }
 0x706   :  { %1433 = vrot.lane.b32.xlu1 %v1275_v45, %s2272_s30 }
 0x70e   :  { %1469 = vrot.lane.b32.xlu1 %v2485_v61, %s2269_s0 }
 0x716   :  { %1471 = vrot.lane.b32.xlu1 %v2489_v63, %s2269_s0 }
 0x717   :  { %v1387_v42 = vpop.permute.xlu2 %1386 }
 0x71e   :  { %1473 = vrot.lane.b32.xlu1 %v2493_v2, %s2269_s0 }
 0x71f   :  { %v1430_v51 = vpop.permute.xlu2 %1429 }
 0x727   :  { %v1466_v46 = vpop.permute.xlu2 %1465 }
 0x72f   :  { %v1345_v18 = vpop.permute.xlu0 %1344  ;;  %v1351_v20 = vpop.permute.xlu2 %1350 }
 0x730   :  { %v1362_v53 = vrot.slane %v1345_v18, 4  ;;  %v1365_v50 = vrot.slane %v1351_v20, 4 }
 0x737   :  { %v1347_v13 = vpop.permute.xlu0 %1346 }
 0x738   :  { %v1363_v52 = vrot.slane %v1347_v13, 4 }
 0x73a   :  { %v1372_v60 = vsel %vm746_vm2, %v1362_v53, %v1363_v52 }
 0x73b   :  { %v1375_v14 = vsel %vm754_vm6, %v1372_v60, 0.0  ;;  %v1336_v60 = vsel %vm1176_vm12, %v2979_v44, 0.0  ;;  %v1337_v44 = vsel %vm1177_vm14, %v2984_v39, 0.0  ;;  %vm1583_vm6 = vcmp.ge.f32.partialorder %v2939_v62, 16.0 }
 0x73c   :  { %v1381_v25 = vadd.f32 %v1375_v14, %v1333_v9 }
 0x73f   :  { %v1389_v43 = vpop.permute.xlu0 %1388 }
 0x740   :  { %v1405_v8 = vadd.f32 %v1389_v43, %v1381_v25  ;;  %v1393_v43 = vpop.permute.xlu2 %1392 }
 0x742   :  { %v1412_v5 = vadd.f32 %v3028_v11, %v1405_v8 }
 0x744   :  { %v1418_v40 = vmax.f32 %v1412_v5, 0.0 }
 0x747   :  { %v1432_v54 = vpop.permute.xlu0 %1431 }
 0x748   :  { %v1448_v37 = vadd.f32 %v1432_v54, %v1418_v40  ;;  %v1436_v14 = vpop.permute.xlu2 %1435 }
 0x74a   :  { %v1454_v36 = vmax.f32 %v1448_v37, 0.0 }
 0x74f   :  { %v1468_v19 = vpop.permute.xlu0 %1467 }
 0x750   :  { %v1438_v5 = vpop.permute.xlu2 %1437 }
 0x757   :  { %v1353_v31 = vpop.permute.xlu0 %1352 }
 0x758   :  { %v1355_v49 = vpop.permute.xlu1 %1354  ;;  %v1366_v18 = vrot.slane %v1353_v31, 4  ;;  %v1440_v39 = vpop.permute.xlu2 %1439 }
 0x759   :  { %v1367_v38 = vrot.slane %v1355_v49, 4 }
 0x75a   :  { %v1369_v55 = vsel %vm746_vm2, %v1365_v50, %v1366_v18 }
 0x75b   :  { %v1373_v1 = vsel %vm746_vm2, %v1367_v38, %v1362_v53  ;;  %v1378_v29 = vsel %vm757_vm11, %v1369_v55, 0.0 }
 0x75c   :  { %v1374_v6 = vsel %vm753_vm4, %v1373_v1, 0.0  ;;  %vm1582_vm4 = vcmp.ge.f32.partialorder %v2925_v12, 16.0 }
 0x75d   :  { %v1380_v15 = vadd.f32 %v1374_v6, %v1332_v3  ;;  %v1384_v3 = vadd.f32 %v1378_v29, %v1336_v60  ;;  %v1576_v29 = vld [vmem:[#allocation2 + $0x1d0] sm:$0xff] }
 0x75e   :  { %1706 = vmatpush.msra.mxu3 %v1576_v29 }
 0x75f   :  { %v1404_v28 = vadd.f32 %v1387_v42, %v1380_v15  ;;  %v1395_v53 = vpop.permute.xlu0 %1394  ;;  %v1368_v15 = vsel %vm746_vm2, %v1366_v18, %v1367_v38 }
 0x760   :  { %v1464_v57 = vpop.permute.xlu1 %1463  ;;  %v1408_v6 = vadd.f32 %v1395_v53, %v1384_v3  ;;  %v1379_v17 = vsel %vm758_vm13, %v1368_v15, 0.0  ;;  %v1575_v53 = vld [vmem:[#allocation2 + $0x1c8] sm:$0xff] }
 0x761   :  { %v1411_v24 = vadd.f32 %v3028_v11, %v1404_v28  ;;  %2171 = vmatmul.msk.f32.vlgmr.msra.gmra.mxu2 %vm253_vm1, %v1464_v57  ;;  %1707 = vmatpush.msra.mxu3 %v1575_v53 }
 0x762   :  { %v1415_v28 = vadd.f32 %v3028_v11, %v1408_v6 }
 0x763   :  { %v1417_v32 = vmax.f32 %v1411_v24, 0.0 }
 0x764   :  { %v1421_v21 = vmax.f32 %v1415_v28, 0.0 }
 0x765   :  { %v1447_v23 = vadd.f32 %v1430_v51, %v1417_v32 }
 0x767   :  { %v1453_v41 = vmax.f32 %v1447_v23, 0.0  ;;  %v1397_v8 = vpop.permute.xlu0 %1396  ;;  %v1451_v23 = vadd.f32 %v1438_v5, %v1421_v21 }
 0x768   :  { %v1349_v26 = vpop.permute.xlu1 %1348 }
 0x769   :  { %v1364_v22 = vrot.slane %v1349_v26, 4  ;;  %2172 = vmatmul.msk.f32.gmra.mxu2 %vm253_vm1, %v1466_v46  ;;  %2177 = vmatmul.msk.f32.vlgmr.msrb.gmra.mxu0 %vm253_vm1, %v1453_v41  ;;  %v1457_v26 = vmax.f32 %v1451_v23, 0.0 }
 0x76b   :  { %v1370_v7 = vsel %vm746_vm2, %v1364_v22, %v1365_v50  ;;  %v1371_v47 = vsel %vm746_vm2, %v1363_v52, %v1364_v22  ;;  %vm1581_vm2 = vcmp.ge.f32.partialorder %v2915_v30, 16.0 }
 0x76c   :  { %v1377_v45 = vsel %vm756_vm9, %v1370_v7, 0.0  ;;  %v1376_v16 = vsel %vm755_vm7, %v1371_v47, 0.0  ;;  %vm1584_vm7 = vcmp.ge.f32.partialorder %v2951_v35, 16.0  ;;  %vm2093_vm9 = vcmask 7168  }
 0x76d   :  { %v1383_v13 = vadd.f32 %v1377_v45, %v1335_v48  ;;  %v1382_v42 = vadd.f32 %v1376_v16, %v1334_v10 }
 0x76f   :  { %v1407_v34 = vadd.f32 %v1393_v43, %v1383_v13 }
 0x770   :  { %v1391_v51 = vpop.permute.xlu1 %1390 }
 0x771   :  { %v1406_v52 = vadd.f32 %v1391_v51, %v1382_v42  ;;  %2173 = vmatmul.msk.f32.gmra.mxu2 %vm253_vm1, %v1468_v19  ;;  %2178 = vmatmul.msk.f32.gmra.mxu0 %vm253_vm1, %v1454_v36  ;;  %v1414_v49 = vadd.f32 %v3028_v11, %v1407_v34  ;;  %v1385_v19 = vadd.f32 %v1379_v17, %v1337_v44  ;;  %v3112_v34 = vld [vmem:[#allocation2 + $0x1c0] ss:$0 sm:$0xff] }
 0x773   :  { %v1413_v0 = vadd.f32 %v3028_v11, %v1406_v52  ;;  %v1420_v25 = vmax.f32 %v1414_v49, 0.0  ;;  %v1409_v38 = vadd.f32 %v1397_v8, %v1385_v19 }
 0x775   :  { %v1419_v54 = vmax.f32 %v1413_v0, 0.0  ;;  %v1450_v57 = vadd.f32 %v1436_v14, %v1420_v25  ;;  %v1416_v27 = vadd.f32 %v3028_v11, %v1409_v38 }
 0x777   :  { %v1456_v32 = vmax.f32 %v1450_v57, 0.0  ;;  %v1422_v41 = vmax.f32 %v1416_v27, 0.0 }
 0x778   :  { %v1434_v1 = vpop.permute.xlu1 %1433 }
 0x779   :  { %v1449_v46 = vadd.f32 %v1434_v1, %v1419_v54  ;;  %v1452_v50 = vadd.f32 %v1440_v39, %v1422_v41 }
 0x77b   :  { %v1455_v9 = vmax.f32 %v1449_v46, 0.0  ;;  %v1458_v22 = vmax.f32 %v1452_v50, 0.0 }
 0x77d   :  { %2179 = vmatmul.msk.f32.gmra.mxu0 %vm253_vm1, %v1455_v9 }
 0x780   :  { %v1470_v24 = vpop.permute.xlu1 %1469 }
 0x781   :  { %2174 = vmatmul.msk.f32.gmra.mxu2 %vm253_vm1, %v1470_v24 }
 0x785   :  { %2180 = vmatmul.msk.f32.gmra.mxu0 %vm253_vm1, %v1456_v32 }
 0x788   :  { %v1472_v20 = vpop.permute.xlu1 %1471 }
 0x789   :  { %2175 = vmatmul.msk.f32.gmra.mxu2 %vm253_vm1, %v1472_v20 }
 0x78d   :  { %2181 = vmatmul.msk.f32.gmra.mxu0 %vm253_vm1, %v1457_v26 }
 0x790   :  { %v1474_v40 = vpop.permute.xlu1 %1473 }
 0x791   :  { %2176 = vmatmul.msk.f32.gmra.mxu2 %vm253_vm1, %v1474_v40 }
 0x795   :  { %2182 = vmatmul.msk.f32.gmra.mxu0 %vm253_vm1, %v1458_v22 }
 0x7e4   :  { %v1504_v37 = vpop.f32.mrf.mxu2 }
 0x7e6   :  { %v1557_v7 = vpop.f32.mrf.mxu0 }
 0x7e7   :  { %v3076_v47 = vadd.f32 %v1557_v7, %v1504_v37 }
 0x7e9   :  { %1597 = vrot.lane.b32.xlu2 %v3076_v47, %s2270_s28  ;;  %1627 = vrot.lane.b32.xlu1 %v3076_v47, %s2269_s0  ;;  %v1587_v24 = vsel %vm1581_vm2, %v3076_v47, 0.0 }
 0x7ec   :  { %v1507_v11 = vpop.f32.mrf.mxu2 }
 0x7ee   :  { %v1560_v31 = vpop.f32.mrf.mxu0 }
 0x7ef   :  { %v3082_v45 = vadd.f32 %v1560_v31, %v1507_v11 }
 0x7f1   :  { %1599 = vrot.lane.b32.xlu1 %v3082_v45, %s2270_s28  ;;  %v1588_v20 = vsel %vm1582_vm4, %v3082_v45, 0.0 }
 0x7f4   :  { %v1510_v16 = vpop.f32.mrf.mxu2 }
 0x7fa   :  { %v1563_v48 = vpop.f32.mrf.mxu0 }
 0x7fb   :  { %v3086_v10 = vadd.f32 %v1563_v48, %v1510_v16 }
 0x7fd   :  { %1631 = vrot.lane.b32.xlu2 %v3086_v10, %s2269_s0  ;;  %v1589_v11 = vsel %vm1583_vm6, %v3086_v10, 0.0 }
 0x802   :  { %v1566_v36 = vpop.f32.mrf.mxu0 }
 0x804   :  { %v1513_v18 = vpop.f32.mrf.mxu2 }
 0x805   :  { %v3090_v13 = vadd.f32 %v1566_v36, %v1513_v18 }
 0x807   :  { %1603 = vrot.lane.b32.xlu2 %v3090_v13, %s2270_s28  ;;  %1633 = vrot.lane.b32.xlu1 %v3090_v13, %s2269_s0 }
 0x80a   :  { %v1569_v42 = vpop.f32.mrf.mxu0 }
 0x80c   :  { %v1516_v43 = vpop.f32.mrf.mxu2 }
 0x80d   :  { %v3096_v51 = vadd.f32 %v1569_v42, %v1516_v43  ;;  %v1590_v43 = vsel %vm1584_vm7, %v3090_v13, 0.0 }
 0x80f   :  { %1605 = vrot.lane.b32.xlu1 %v3096_v51, %s2270_s28  ;;  %v1585_v1 = vsel %vm1579_vm15, %v3096_v51, 0.0 }
 0x812   :  { %v1572_v52 = vpop.f32.mrf.mxu0 }
 0x814   :  { %v1519_v55 = vpop.f32.mrf.mxu2 }
 0x815   :  { %v3100_v0 = vadd.f32 %v1572_v52, %v1519_v55 }
 0x817   :  { %1607 = vrot.lane.b32.xlu0 %v3100_v0, %s2270_s28  ;;  %1637 = vrot.lane.b32.xlu2 %v3100_v0, %s2269_s0  ;;  %v1586_v15 = vsel %vm1580_vm0, %v3100_v0, 0.0 }
 0x81f   :  { %1629 = vrot.lane.b32.xlu0 %v3082_v45, %s2269_s0 }
 0x827   :  { %1601 = vrot.lane.b32.xlu0 %v3086_v10, %s2270_s28 }
 0x82f   :  { %1635 = vrot.lane.b32.xlu0 %v3096_v51, %s2269_s0 }
 0x837   :  { %1665 = vrot.lane.b32.xlu0 %v3112_v34, %s2271_s29 }
 0x843   :  { %v1598_v60 = vpop.permute.xlu2 %1597 }
 0x844   :  { %v1616_v14 = vsel %vm1173_vm5, %v1598_v60, 0.0 }
 0x845   :  { %v1622_v17 = vadd.f32 %v1616_v14, %v1586_v15 }
 0x857   :  { %v1632_v38 = vpop.permute.xlu2 %1631 }
 0x85b   :  { %v1628_v54 = vpop.permute.xlu1 %1627 }
 0x861   :  { %v1604_v50 = vpop.permute.xlu2 %1603 }
 0x862   :  { %v1619_v37 = vsel %vm1176_vm12, %v1604_v50, 0.0 }
 0x863   :  { %v1600_v9 = vpop.permute.xlu1 %1599  ;;  %v1625_v16 = vadd.f32 %v1619_v37, %v1589_v11 }
 0x864   :  { %v1617_v44 = vsel %vm1174_vm8, %v1600_v9, 0.0 }
 0x865   :  { %v1623_v19 = vadd.f32 %v1617_v44, %v1587_v24  ;;  %v1842_v44 = vld [vmem:[#allocation2 + $0x1e0] sm:$0xff] }
 0x867   :  { %v1647_v32 = vadd.f32 %v1632_v38, %v1623_v19 }
 0x869   :  { %v1654_v39 = vadd.f32 %v3112_v34, %v1647_v32 }
 0x86b   :  { %v1660_v22 = vmax.f32 %v1654_v39, 0.0 }
 0x871   :  { %v1638_v29 = vpop.permute.xlu2 %1637 }
 0x879   :  { %v1634_v41 = vpop.permute.xlu1 %1633 }
 0x881   :  { %v1606_v48 = vpop.permute.xlu1 %1605 }
 0x882   :  { %v1620_v42 = vsel %vm1177_vm14, %v1606_v48, 0.0 }
 0x883   :  { %v1626_v52 = vadd.f32 %v1620_v42, %v1590_v43 }
 0x885   :  { %v1650_v53 = vadd.f32 %v1638_v29, %v1626_v52 }
 0x889   :  { %v1608_v49 = vpop.permute.xlu0 %1607 }
 0x88a   :  { %v1615_v3 = vsel %vm1172_vm3, %v1608_v49, 0.0  ;;  %v1657_v49 = vadd.f32 %v3112_v34, %v1650_v53 }
 0x88b   :  { %v1621_v46 = vadd.f32 %v1615_v3, %v1585_v1 }
 0x88c   :  { %v1663_v60 = vmax.f32 %v1657_v49, 0.0 }
 0x88d   :  { %v1645_v6 = vadd.f32 %v1628_v54, %v1621_v46 }
 0x88f   :  { %v1652_v25 = vadd.f32 %v3112_v34, %v1645_v6 }
 0x891   :  { %v1658_v28 = vmax.f32 %v1652_v25, 0.0  ;;  %v1630_v57 = vpop.permute.xlu0 %1629 }
 0x892   :  { %v1646_v8 = vadd.f32 %v1630_v57, %v1622_v17  ;;  %v1845_v17 = vld [vmem:[#allocation2 + $0x1f8] sm:$0xff] }
 0x893   :  { %2183 = vmatmul.msk.f32.vlgmr.msra.gmra.mxu3 %vm253_vm1, %v1658_v28  ;;  %1884 = vmatpush.msra.mxu1 %v1845_v17  ;;  %v1843_v28 = vld [vmem:[#allocation2 + $0x1e8] sm:$0xff] }
 0x894   :  { %v1653_v21 = vadd.f32 %v3112_v34, %v1646_v8  ;;  %1937 = vmatpush.msrb.mxu2 %v1843_v28 }
 0x896   :  { %v1659_v5 = vmax.f32 %v1653_v21, 0.0  ;;  %1938 = vmatpush.msrb.mxu2 %v1842_v44 }
 0x899   :  { %v1602_v27 = vpop.permute.xlu0 %1601 }
 0x89a   :  { %v1618_v23 = vsel %vm1175_vm10, %v1602_v27, 0.0 }
 0x89b   :  { %2184 = vmatmul.msk.f32.gmra.mxu3 %vm253_vm1, %v1659_v5  ;;  %v1624_v26 = vadd.f32 %v1618_v23, %v1588_v20  ;;  %v2228_v23 = vld [vmem:[#allocation2 + $0x1d8] ss:$0 sm:$0xff] }
 0x89d   :  { %v1648_v40 = vadd.f32 %v1634_v41, %v1624_v26 }
 0x89f   :  { %v1655_v7 = vadd.f32 %v3112_v34, %v1648_v40 }
 0x8a1   :  { %v1636_v31 = vpop.permute.xlu0 %1635  ;;  %v1661_v36 = vmax.f32 %v1655_v7, 0.0 }
 0x8a2   :  { %v1649_v18 = vadd.f32 %v1636_v31, %v1625_v16 }
 0x8a3   :  { %2185 = vmatmul.msk.f32.gmra.mxu3 %vm253_vm1, %v1660_v22 }
 0x8a4   :  { %v1656_v55 = vadd.f32 %v3112_v34, %v1649_v18 }
 0x8a6   :  { %v1662_v54 = vmax.f32 %v1656_v55, 0.0 }
 0x8a9   :  { %v1666_v46 = vpop.permute.xlu0 %1665 }
 0x8aa   :  { %v1670_v14 = vadd.f32 %v1666_v46, %v3086_v10  ;;  %v1671_v15 = vadd.f32 %v1666_v46, %v3090_v13  ;;  %v1668_v10 = vadd.f32 %v1666_v46, %v3076_v47  ;;  %v1669_v13 = vadd.f32 %v1666_v46, %v3082_v45 }
 0x8ab   :  { %2186 = vmatmul.msk.f32.gmra.mxu3 %vm253_vm1, %v1661_v36  ;;  %v1672_v47 = vadd.f32 %v1666_v46, %v3096_v51  ;;  %v1673_v45 = vadd.f32 %v1666_v46, %v3100_v0 }
 0x8b3   :  { %2187 = vmatmul.msk.f32.gmra.mxu3 %vm253_vm1, %v1662_v54 }
 0x8bb   :  { %2188 = vmatmul.msk.f32.gmra.mxu3 %vm253_vm1, %v1663_v60 }
 0x916   :  { %v3164_v1 = vpop.f32.mrf.mxu3 }
 0x917   :  { %1739 = vrot.lane.b32.xlu0 %v3164_v1, %s2270_s28  ;;  %1769 = vrot.lane.b32.xlu2 %v3164_v1, %s2269_s0  ;;  %v1729_v40 = vsel %vm1581_vm2, %v3164_v1, 0.0 }
 0x91e   :  { %v3170_v3 = vpop.f32.mrf.mxu3 }
 0x91f   :  { %1741 = vrot.lane.b32.xlu0 %v3170_v3, %s2270_s28  ;;  %1771 = vrot.lane.b32.xlu2 %v3170_v3, %s2269_s0  ;;  %v1730_v53 = vsel %vm1582_vm4, %v3170_v3, 0.0 }
 0x926   :  { %v3176_v34 = vpop.f32.mrf.mxu3 }
 0x927   :  { %1846 = vrot.lane.b32.xlu0 %v2473_v56, %s2272_s30  ;;  %1773 = vrot.lane.b32.xlu2 %v3176_v34, %s2269_s0 }
 0x92e   :  { %v3183_v6 = vpop.f32.mrf.mxu3 }
 0x92f   :  { %1816 = vrot.lane.b32.xlu2 %v1670_v14, %s2272_s30  ;;  %1775 = vrot.lane.b32.xlu0 %v3183_v6, %s2269_s0  ;;  %v1732_v44 = vsel %vm1584_vm7, %v3183_v6, 0.0 }
 0x936   :  { %v1721_v9 = vpop.f32.mrf.mxu3 }
 0x937   :  { %1745 = vrot.lane.b32.xlu2 %v3183_v6, %s2270_s28  ;;  %1818 = vrot.lane.b32.xlu0 %v1671_v15, %s2272_s30  ;;  %v1727_v38 = vsel %vm1579_vm15, %v1721_v9, 0.0 }
 0x93e   :  { %v1724_v25 = vpop.f32.mrf.mxu3 }
 0x93f   :  { %1850 = vrot.lane.b32.xlu2 %v2481_v59, %s2272_s30  ;;  %1747 = vrot.lane.b32.xlu0 %v1721_v9, %s2270_s28 }
 0x940   :  { %1749 = vrot.lane.b32.xlu1 %v1724_v25, %s2270_s28 }
 0x947   :  { %1852 = vrot.lane.b32.xlu0 %v2485_v61, %s2272_s30  ;;  %1779 = vrot.lane.b32.xlu2 %v1724_v25, %s2269_s0 }
 0x948   :  { %1812 = vrot.lane.b32.xlu1 %v1668_v10, %s2272_s30 }
 0x94f   :  { %1856 = vrot.lane.b32.xlu0 %v2493_v2, %s2272_s30  ;;  %1854 = vrot.lane.b32.xlu2 %v2489_v63, %s2272_s30 }
 0x950   :  { %1814 = vrot.lane.b32.xlu1 %v1669_v13, %s2272_s30 }
 0x957   :  { %2069 = vrot.lane.b32.xlu0 %v2473_v56, %s2273_s3  ;;  %v1844_v56 = vld [vmem:[#allocation2 + $0x1f0] sm:$0xff] }
 0x958   :  { %1743 = vrot.lane.b32.xlu1 %v3176_v34, %s2270_s28  ;;  %1885 = vmatpush.msra.mxu1 %v1844_v56 }
 0x960   :  { %1848 = vrot.lane.b32.xlu1 %v2477_v58, %s2272_s30 }
 0x968   :  { %1777 = vrot.lane.b32.xlu1 %v1721_v9, %s2269_s0 }
 0x970   :  { %1820 = vrot.lane.b32.xlu1 %v1672_v47, %s2272_s30 }
 0x971   :  { %v1770_v24 = vpop.permute.xlu2 %1769 }
 0x978   :  { %1822 = vrot.lane.b32.xlu1 %v1673_v45, %s2272_s30  ;;  %v1731_v45 = vsel %vm1583_vm6, %v3176_v34, 0.0 }
 0x979   :  { %v1772_v0 = vpop.permute.xlu2 %1771 }
 0x980   :  { %2071 = vrot.lane.b32.xlu1 %v2477_v58, %s2273_s3  ;;  %v1728_v58 = vsel %vm1580_vm0, %v1724_v25, 0.0 }
 0x981   :  { %v1774_v26 = vpop.permute.xlu2 %1773 }
 0x989   :  { %v1740_v57 = vpop.permute.xlu0 %1739  ;;  %v1817_v48 = vpop.permute.xlu2 %1816 }
 0x98a   :  { %v1758_v19 = vsel %vm1173_vm5, %v1740_v57, 0.0 }
 0x98b   :  { %v1764_v27 = vadd.f32 %v1758_v19, %v1728_v58 }
 0x98d   :  { %v1788_v50 = vadd.f32 %v1772_v0, %v1764_v27 }
 0x98f   :  { %v1795_v33 = vadd.f32 %v2228_v23, %v1788_v50 }
 0x991   :  { %v1742_v8 = vpop.permute.xlu0 %1741  ;;  %v1801_v16 = vmax.f32 %v1795_v33, 0.0  ;;  %v1746_v49 = vpop.permute.xlu2 %1745 }
 0x992   :  { %v1759_v41 = vsel %vm1174_vm8, %v1742_v8, 0.0  ;;  %v1761_v13 = vsel %vm1176_vm12, %v1746_v49, 0.0 }
 0x993   :  { %v1765_v22 = vadd.f32 %v1759_v41, %v1729_v40  ;;  %v1767_v17 = vadd.f32 %v1761_v13, %v1731_v45  ;;  %v1973_v41 = vld [vmem:[#allocation2 + $0x210] sm:$0xff] }
 0x994   :  { %2008 = vmatpush.msra.mxu0 %v1973_v41 }
 0x995   :  { %v1789_v11 = vadd.f32 %v1774_v26, %v1765_v22  ;;  %v1972_v26 = vld [vmem:[#allocation2 + $0x208] sm:$0xff] }
 0x996   :  { %2009 = vmatpush.msra.mxu0 %v1972_v26 }
 0x997   :  { %v1796_v36 = vadd.f32 %v2228_v23, %v1789_v11 }
 0x999   :  { %v1847_v51 = vpop.permute.xlu0 %1846  ;;  %v1802_v55 = vmax.f32 %v1796_v36, 0.0  ;;  %v1851_v3 = vpop.permute.xlu2 %1850 }
 0x99a   :  { %2189 = vmatmul.msk.f32.vlgmr.msra.gmra.mxu1 %vm253_vm1, %v1847_v51 }
 0x99b   :  { %v1832_v29 = vadd.f32 %v1817_v48, %v1802_v55 }
 0x99d   :  { %v1838_v14 = vmax.f32 %v1832_v29, 0.0 }
 0x9a1   :  { %v1776_v42 = vpop.permute.xlu0 %1775 }
 0x9a9   :  { %v1819_v1 = vpop.permute.xlu0 %1818 }
 0x9b1   :  { %v1748_v12 = vpop.permute.xlu0 %1747 }
 0x9b2   :  { %v1750_v21 = vpop.permute.xlu1 %1749  ;;  %v1762_v28 = vsel %vm1177_vm14, %v1748_v12, 0.0 }
 0x9b3   :  { %v1757_v32 = vsel %vm1172_vm3, %v1750_v21, 0.0  ;;  %v1768_v8 = vadd.f32 %v1762_v28, %v1732_v44 }
 0x9b4   :  { %v1763_v5 = vadd.f32 %v1757_v32, %v1727_v38 }
 0x9b6   :  { %v1787_v20 = vadd.f32 %v1770_v24, %v1763_v5  ;;  %v1780_v24 = vpop.permute.xlu2 %1779 }
 0x9b7   :  { %v1792_v0 = vadd.f32 %v1780_v24, %v1768_v8 }
 0x9b8   :  { %v1794_v39 = vadd.f32 %v2228_v23, %v1787_v20 }
 0x9b9   :  { %v1853_v34 = vpop.permute.xlu0 %1852  ;;  %v1799_v32 = vadd.f32 %v2228_v23, %v1792_v0 }
 0x9ba   :  { %v1800_v4 = vmax.f32 %v1794_v39, 0.0  ;;  %v1813_v37 = vpop.permute.xlu1 %1812  ;;  %v2229_v39 = vld [vmem:[#allocation2 + $0x200] ss:$0 sm:$0xff] }
 0x9bb   :  { %v1805_v58 = vmax.f32 %v1799_v32, 0.0 }
 0x9bc   :  { %v1830_v7 = vadd.f32 %v1813_v37, %v1800_v4 }
 0x9be   :  { %v1836_v31 = vmax.f32 %v1830_v7, 0.0  ;;  %v1855_v5 = vpop.permute.xlu2 %1854 }
 0x9c0   :  { %2195 = vmatmul.msk.f32.vlgmr.msrb.gmra.mxu2 %vm253_vm1, %v1836_v31 }
 0x9c1   :  { %v1857_v6 = vpop.permute.xlu0 %1856 }
 0x9c2   :  { %v1815_v18 = vpop.permute.xlu1 %1814 }
 0x9c3   :  { %v1831_v43 = vadd.f32 %v1815_v18, %v1801_v16 }
 0x9c5   :  { %v1837_v52 = vmax.f32 %v1831_v43, 0.0 }
 0x9c8   :  { %2196 = vmatmul.msk.f32.gmra.mxu2 %vm253_vm1, %v1837_v52 }
 0x9ca   :  { %v1744_v30 = vpop.permute.xlu1 %1743 }
 0x9cb   :  { %v1760_v54 = vsel %vm1175_vm10, %v1744_v30, 0.0 }
 0x9cc   :  { %v1766_v60 = vadd.f32 %v1760_v54, %v1730_v53 }
 0x9ce   :  { %v1790_v46 = vadd.f32 %v1776_v42, %v1766_v60 }
 0x9d0   :  { %v1797_v15 = vadd.f32 %v2228_v23, %v1790_v46  ;;  %2197 = vmatmul.msk.f32.gmra.mxu2 %vm253_vm1, %v1838_v14 }
 0x9d2   :  { %v1803_v9 = vmax.f32 %v1797_v15, 0.0  ;;  %v1849_v25 = vpop.permute.xlu1 %1848 }
 0x9d3   :  { %2190 = vmatmul.msk.f32.gmra.mxu1 %vm253_vm1, %v1849_v25 }
 0x9d4   :  { %v1833_v10 = vadd.f32 %v1819_v1, %v1803_v9 }
 0x9d6   :  { %v1839_v47 = vmax.f32 %v1833_v10, 0.0  ;;  %v2230_v10 = vld [vmem:[#allocation2 + $0x218] ss:$0 sm:$0xff] }
 0x9d8   :  { %2198 = vmatmul.msk.f32.gmra.mxu2 %vm253_vm1, %v1839_v47  ;;  %v2231_v47 = vld [vmem:[#allocation2 + $0x220] ss:$0 sm:$0xff] }
 0x9da   :  { %v1778_v56 = vpop.permute.xlu1 %1777 }
 0x9db   :  { %v1791_v57 = vadd.f32 %v1778_v56, %v1767_v17  ;;  %2191 = vmatmul.msk.f32.gmra.mxu1 %vm253_vm1, %v1851_v3 }
 0x9dd   :  { %v1798_v51 = vadd.f32 %v2228_v23, %v1791_v57 }
 0x9df   :  { %v1804_v62 = vmax.f32 %v1798_v51, 0.0 }
 0x9e2   :  { %v1821_v19 = vpop.permute.xlu1 %1820 }
 0x9e3   :  { %v1834_v21 = vadd.f32 %v1821_v19, %v1804_v62  ;;  %2192 = vmatmul.msk.f32.gmra.mxu1 %vm253_vm1, %v1853_v34 }
 0x9e5   :  { %v1840_v38 = vmax.f32 %v1834_v21, 0.0 }
 0x9e7   :  { %2199 = vmatmul.msk.f32.gmra.mxu2 %vm253_vm1, %v1840_v38 }
 0x9ea   :  { %v1823_v27 = vpop.permute.xlu1 %1822 }
 0x9eb   :  { %v1835_v20 = vadd.f32 %v1823_v27, %v1805_v58  ;;  %2193 = vmatmul.msk.f32.gmra.mxu1 %vm253_vm1, %v1855_v5 }
 0x9ed   :  { %v1841_v35 = vmax.f32 %v1835_v20, 0.0 }
 0x9ef   :  { %2200 = vmatmul.msk.f32.gmra.mxu2 %vm253_vm1, %v1841_v35 }
 0x9f3   :  { %2194 = vmatmul.msk.f32.gmra.mxu1 %vm253_vm1, %v1857_v6 }
 0xa17   :  { %v1887_v23 = vpop.f32.mrf.mxu1 }
 0xa43   :  { %v1940_v50 = vpop.f32.mrf.mxu2 }
 0xa44   :  { %v1941_v40 = vadd.f32 %v1940_v50, %v1887_v23 }
 0xa46   :  { %v1960_v22 = vadd.f32 %v2229_v39, %v1941_v40  ;;  %v2072_v40 = vpop.permute.xlu1 %2071 }
 0xa48   :  { %v1966_v4 = vmax.f32 %v1960_v22, 0.0  ;;  %v2232_v22 = vld [vmem:[#allocation2 + $0x228] ss:$0 sm:$0xff] }
 0xa4a   :  { %2201 = vmatmul.msk.f32.vlgmr.msra.gmra.mxu0 %vm253_vm1, %v1966_v4 }
 0xa4b   :  { %v1943_v37 = vpop.f32.mrf.mxu2 }
 0xa50   :  { %v1890_v7 = vpop.f32.mrf.mxu1 }
 0xa51   :  { %v1944_v33 = vadd.f32 %v1943_v37, %v1890_v7  ;;  %v2070_v7 = vpop.permute.xlu0 %2069 }
 0xa53   :  { %v1961_v11 = vadd.f32 %v2229_v39, %v1944_v33  ;;  %v1946_v16 = vpop.f32.mrf.mxu2 }
 0xa55   :  { %v1967_v31 = vmax.f32 %v1961_v11, 0.0 }
 0xa57   :  { %2202 = vmatmul.msk.f32.gmra.mxu0 %vm253_vm1, %v1967_v31 }
 0xa58   :  { %v1893_v48 = vpop.f32.mrf.mxu1 }
 0xa59   :  { %v1947_v36 = vadd.f32 %v1946_v16, %v1893_v48 }
 0xa5b   :  { %v1962_v18 = vadd.f32 %v2229_v39, %v1947_v36  ;;  %v1949_v43 = vpop.f32.mrf.mxu2 }
 0xa5d   :  { %v1968_v42 = vmax.f32 %v1962_v18, 0.0 }
 0xa5f   :  { %2203 = vmatmul.msk.f32.gmra.mxu0 %vm253_vm1, %v1968_v42 }
 0xa60   :  { %v1896_v52 = vpop.f32.mrf.mxu1 }
 0xa61   :  { %v1950_v55 = vadd.f32 %v1949_v43, %v1896_v52 }
 0xa63   :  { %v1963_v30 = vadd.f32 %v2229_v39, %v1950_v55 }
 0xa65   :  { %v1969_v29 = vmax.f32 %v1963_v30, 0.0 }
 0xa67   :  { %2204 = vmatmul.msk.f32.gmra.mxu0 %vm253_vm1, %v1969_v29 }
 0xa68   :  { %v1899_v53 = vpop.f32.mrf.mxu1 }
 0xa6a   :  { %v1952_v54 = vpop.f32.mrf.mxu2 }
 0xa6b   :  { %v1953_v49 = vadd.f32 %v1952_v54, %v1899_v53 }
 0xa6d   :  { %v1964_v60 = vadd.f32 %v2229_v39, %v1953_v49 }
 0xa6f   :  { %v1970_v1 = vmax.f32 %v1964_v60, 0.0 }
 0xa70   :  { %v1902_v46 = vpop.f32.mrf.mxu1 }
 0xa71   :  { %2205 = vmatmul.msk.f32.gmra.mxu0 %vm253_vm1, %v1970_v1 }
 0xa72   :  { %v1955_v14 = vpop.f32.mrf.mxu2 }
 0xa73   :  { %v1956_v15 = vadd.f32 %v1955_v14, %v1902_v46 }
 0xa75   :  { %v1965_v9 = vadd.f32 %v2229_v39, %v1956_v15 }
 0xa77   :  { %v1971_v25 = vmax.f32 %v1965_v9, 0.0 }
 0xa79   :  { %2206 = vmatmul.msk.f32.gmra.mxu0 %vm253_vm1, %v1971_v25 }
 0xac7   :  { %v2011_v13 = vpop.f32.mrf.mxu0 }
 0xac8   :  { %v2012_v3 = vadd.f32 %v2230_v10, %v2011_v13 }
 0xaca   :  { %v2029_v12 = vmax.f32 %v2012_v3, 0.0 }
 0xacc   :  { %v2037_v45 = vmul.f32 %v2231_v47, %v2029_v12 }
 0xace   :  { %v2043_v17 = vsel %vm253_vm1, %v2037_v45, 0.0 }
 0xacf   :  { %2044 = vadd.xlane.f32.xlu1 %v2043_v17 }
 0xad4   :  { %v2014_v28 = vpop.f32.mrf.mxu0 }
 0xad5   :  { %v2015_v56 = vadd.f32 %v2230_v10, %v2014_v28 }
 0xad7   :  { %v2030_v57 = vmax.f32 %v2015_v56, 0.0 }
 0xad9   :  { %v2038_v44 = vmul.f32 %v2231_v47, %v2030_v57 }
 0xadb   :  { %v2046_v8 = vsel %vm253_vm1, %v2038_v44, 0.0 }
 0xadc   :  { %v2017_v51 = vpop.f32.mrf.mxu0  ;;  %2047 = vadd.xlane.f32.xlu2 %v2046_v8 }
 0xadd   :  { %v2018_v24 = vadd.f32 %v2230_v10, %v2017_v51 }
 0xadf   :  { %v2031_v0 = vmax.f32 %v2018_v24, 0.0 }
 0xae1   :  { %v2039_v62 = vmul.f32 %v2231_v47, %v2031_v0 }
 0xae3   :  { %v2049_v34 = vsel %vm253_vm1, %v2039_v62, 0.0 }
 0xae4   :  { %v2020_v19 = vpop.f32.mrf.mxu0  ;;  %2050 = vadd.xlane.f32.xlu0 %v2049_v34 }
 0xae5   :  { %v2021_v21 = vadd.f32 %v2230_v10, %v2020_v19 }
 0xae7   :  { %v2032_v38 = vmax.f32 %v2021_v21, 0.0 }
 0xae9   :  { %v2040_v32 = vmul.f32 %v2231_v47, %v2032_v38 }
 0xaeb   :  { %v2052_v58 = vsel %vm253_vm1, %v2040_v32, 0.0 }
 0xaec   :  { %2053 = vadd.xlane.f32.xlu2 %v2052_v58 }
 0xaee   :  { %v2023_v5 = vpop.f32.mrf.mxu0 }
 0xaef   :  { %v2024_v27 = vadd.f32 %v2230_v10, %v2023_v5 }
 0xaf1   :  { %v2033_v20 = vmax.f32 %v2024_v27, 0.0 }
 0xaf3   :  { %v2041_v35 = vmul.f32 %v2231_v47, %v2033_v20 }
 0xaf5   :  { %v2055_v6 = vsel %vm253_vm1, %v2041_v35, 0.0 }
 0xaf6   :  { %v2026_v41 = vpop.f32.mrf.mxu0  ;;  %2056 = vadd.xlane.f32.xlu1 %v2055_v6 }
 0xaf7   :  { %v2027_v26 = vadd.f32 %v2230_v10, %v2026_v41 }
 0xaf8   :  { %2075 = vrot.lane.b32.xlu0 %v2485_v61, %s2273_s3 }
 0xaf9   :  { %v2034_v39 = vmax.f32 %v2027_v26, 0.0 }
 0xafb   :  { %v2042_v23 = vmul.f32 %v2231_v47, %v2034_v39 }
 0xafd   :  { %v2058_v50 = vsel %vm253_vm1, %v2042_v23, 0.0 }
 0xafe   :  { %2059 = vadd.xlane.f32.xlu2 %v2058_v50 }
 0xb00   :  { %2079 = vrot.lane.b32.xlu0 %v2493_v2, %s2273_s3 }
 0xb0f   :  { %2077 = vrot.lane.b32.xlu1 %v2489_v63, %s2273_s3 }
 0xb16   :  { %2073 = vrot.lane.b32.xlu2 %v2481_v59, %s2273_s3 }
 0xb42   :  { %v2045_v4 = vpop.xlane.xlu1 %2044 }
 0xb43   :  { %v2063_v37 = vadd.f32 %v2232_v22, %v2045_v4 }
 0xb45   :  { %v2087_v61 = vadd.f32 %v2070_v7, %v2063_v37 }
 0xb47   :  { %2094 = vst.msk [vmem:[%s3306_s2] sm:$0xff] %vm2093_vm9, %v2087_v61 }
 0xb4f   :  { %v2048_v33 = vpop.xlane.xlu2 %2047 }
 0xb50   :  { %v2064_v2 = vadd.f32 %v2232_v22, %v2048_v33 }
 0xb52   :  { %v2088_v11 = vadd.f32 %v2072_v40, %v2064_v2 }
 0xb54   :  { %2095 = vst.msk [vmem:[%s3306_s2 + $0x8] sm:$0xff] %vm2093_vm9, %v2088_v11 }
 0xb57   :  { %v2051_v59 = vpop.xlane.xlu0 %2050 }
 0xb58   :  { %v2065_v52 = vadd.f32 %v2232_v22, %v2051_v59 }
 0xb5f   :  { %v2054_v63 = vpop.xlane.xlu2 %2053 }
 0xb60   :  { %v2066_v31 = vadd.f32 %v2232_v22, %v2054_v63 }
 0xb69   :  { %v2057_v55 = vpop.xlane.xlu1 %2056 }
 0xb6a   :  { %v2076_v16 = vpop.permute.xlu0 %2075  ;;  %v2067_v53 = vadd.f32 %v2232_v22, %v2057_v55 }
 0xb6b   :  { %v2090_v48 = vadd.f32 %v2076_v16, %v2066_v31 }
 0xb6d   :  { %2097 = vst.msk [vmem:[%s3306_s2 + $0x18] sm:$0xff] %vm2093_vm9, %v2090_v48 }
 0xb71   :  { %v2060_v36 = vpop.xlane.xlu2 %2059 }
 0xb72   :  { %v2068_v18 = vadd.f32 %v2232_v22, %v2060_v36  ;;  %v2080_v42 = vpop.permute.xlu0 %2079 }
 0xb74   :  { %v2092_v43 = vadd.f32 %v2080_v42, %v2068_v18 }
 0xb76   :  { %2099 = vst.msk [vmem:[%s3306_s2 + $0x28] sm:$0xff] %vm2093_vm9, %v2092_v43 }
 0xb79   :  { %v2074_v30 = vpop.permute.xlu2 %2073 }
 0xb7a   :  { %v2089_v29 = vadd.f32 %v2074_v30, %v2065_v52 }
 0xb7c   :  { %2096 = vst.msk [vmem:[%s3306_s2 + $0x10] sm:$0xff] %vm2093_vm9, %v2089_v29 }
 0xb81   :  { %v2078_v54 = vpop.permute.xlu1 %2077 }
 0xb82   :  { %v2091_v49 = vadd.f32 %v2078_v54, %v2067_v53 }
 0xb84   :  { %2098 = vst.msk [vmem:[%s3306_s2 + $0x20] sm:$0xff] %vm2093_vm9, %v2091_v49 }
 0xb85   :  { %2104 = vsyncpa [#allocation3], 1 }

</bundles_post_ra>
